<compile_context>
chip_gen: v7x
topology: tpu7x:2x2x1
jax: 0.10.0
libtpu: 0.0.40
codegen_flags: <defaults>
</compile_context>

<pallas_src>
import functools
import math

import jax
import jax.numpy as jnp
from jax.experimental import pallas as pl
from jax.experimental.pallas import tpu as pltpu


def _conv3x3_kernel(x_ref, w_ref, b_ref, o_ref, *, H, W, Cin, Cout):
    """Per-image fused im2col 3x3 same-conv.

    x_ref: (H*W, Cin)        tokens of one image (row-major over (h, w))
    w_ref: (Cout_pad, 9*Cin) packed weights, row index = (kh*3 + kw)*Cin + ci
    b_ref: (Cout_pad, 1)     packed bias
    o_ref: (Cout, H*W)       output in (C, H*W) layout (lane-dense last dim)
    """
    L = H * W

    # One transpose so the spatial dim sits on the 128-lane axis.
    xt = jnp.transpose(x_ref[...], (1, 0))                     # (Cin, L)

    # Zero-extend the flat row so every tap shift is a static in-bounds lane slice
    # (this also realizes the top/bottom "same" padding for free).
    halo = W + 1
    zpad = jnp.zeros((Cin, halo), xt.dtype)
    xt_pad = jnp.concatenate([zpad, xt, zpad], axis=1)         # (Cin, L + 2*(W+1))

    # Column masks for the left/right taps (dw = -1 / +1): positions whose w index
    # would wrap across a row boundary must be zeroed.
    col = jax.lax.broadcasted_iota(jnp.int32, (1, L), 1)
    w_idx = col % W
    left_ok = w_idx != 0
    right_ok = w_idx != (W - 1)
    zero = jnp.zeros((), xt.dtype)

    pieces = []
    for kh in range(3):
        for kw in range(3):
            dh, dw = kh - 1, kw - 1
            s = dh * W + dw                                    # flat shift for this tap
            p = xt_pad[:, halo + s:halo + s + L]               # (Cin, L) static lane slice
            if dw == -1:
                p = jnp.where(left_ok, p, zero)
            elif dw == 1:
                p = jnp.where(right_ok, p, zero)
            pieces.append(p)
    # Sublane-aligned stack (Cin % 8 == 0): effectively free.
    patches = jnp.concatenate(pieces, axis=0)                  # (9*Cin, L)

    # Single MXU pass: (Cout_pad, 9*Cin) @ (9*Cin, L) -> (Cout_pad, L), f32 accum.
    acc = jnp.dot(w_ref[...], patches, preferred_element_type=jnp.float32)
    acc = acc + b_ref[...].astype(jnp.float32)                 # (Cout_pad, 1) broadcast

    # Store only the real output channels; last dim (H*W) stays lane-dense.
    o_ref[...] = acc[:Cout, :].astype(o_ref.dtype)


def output_proj(x, weight, bias):
    """x: (B, L, C); weight: (Cout, Cin, 3, 3) [PyTorch layout]; bias: (Cout,).

    Returns (B, Cout, H, W), matching OutputProj.forward.
    """
    B, L, Cin = x.shape
    H = int(math.sqrt(L))
    W = int(math.sqrt(L))
    assert H * W == L, "OutputProj assumes a square token grid (L = H*W)"
    Cout = weight.shape[0]
    cout_pad = ((Cout + 127) // 128) * 128                      # lane/row-dense MXU dim

    # (Cout, Cin, kh, kw) -> (Cout, kh, kw, Cin) -> (Cout, 9*Cin); zero-pad the
    # output-channel rows to 128 (numerically exact). Do once at init in real use.
    w_packed = jnp.transpose(weight, (0, 2, 3, 1)).reshape(Cout, 9 * Cin)
    w_packed = jnp.pad(w_packed, ((0, cout_pad - Cout), (0, 0)))
    b_packed = jnp.pad(bias, (0, cout_pad - Cout)).reshape(cout_pad, 1)

    kernel = functools.partial(_conv3x3_kernel, H=H, W=W, Cin=Cin, Cout=Cout)

    out_flat = pl.pallas_call(
        kernel,
        out_shape=jax.ShapeDtypeStruct((B, Cout, L), x.dtype),
        grid_spec=pltpu.PrefetchScalarGridSpec(
            num_scalar_prefetch=0,
            grid=(B,),
            in_specs=[
                pl.BlockSpec((None, L, Cin), lambda i: (i, 0, 0)),
                pl.BlockSpec((cout_pad, 9 * Cin), lambda i: (0, 0)),   # resident
                pl.BlockSpec((cout_pad, 1), lambda i: (0, 0)),         # resident
            ],
            out_specs=pl.BlockSpec((None, Cout, L), lambda i: (i, 0, 0)),
        ),
        compiler_params=pltpu.CompilerParams(
            dimension_semantics=("parallel",)),
    )(x, w_packed, b_packed)

    # (B, Cout, H*W) -> (B, Cout, H, W): contiguous reshape, no data movement.
    return out_flat.reshape(B, Cout, H, W)


def _reference(x, weight, bias):
    """Pure-JAX reference mirroring OutputProj.forward (NCHW conv)."""
    B, L, Cin = x.shape
    H = W = int(math.sqrt(L))
    x_nchw = jnp.transpose(x, (0, 2, 1)).reshape(B, Cin, H, W)
    out = jax.lax.conv_general_dilated(
        x_nchw, weight, window_strides=(1, 1), padding=((1, 1), (1, 1)),
        dimension_numbers=("NCHW", "OIHW", "NCHW"))
    return out + bias.reshape(1, -1, 1, 1)


if __name__ == "__main__":
    # Module defaults: in_channel=64, out_channel=3, kernel=3, stride=1, pad=1.
    B, H, W = 2, 16, 16
    Cin, Cout = 64, 3
    L = H * W

    key = jax.random.PRNGKey(0)
    kx, kw, kb = jax.random.split(key, 3)
    x = jax.random.normal(kx, (B, L, Cin), dtype=jnp.float32)
    weight = jax.random.normal(kw, (Cout, Cin, 3, 3), dtype=jnp.float32) * 0.05
    bias = jax.random.normal(kb, (Cout,), dtype=jnp.float32) * 0.1

    out = jax.block_until_ready(output_proj(x, weight, bias))
    ref = jax.block_until_ready(_reference(x, weight, bias))

    assert out.shape == (B, Cout, H, W), out.shape
    assert jnp.allclose(out, ref, atol=1e-4, rtol=1e-4), float(
        jnp.max(jnp.abs(out - ref)))
    print("KERNEL_OK")
</pallas_src>

<mosaic_0001>
module attributes {stable_mosaic.version = 11 : i64} {
  func.func @_conv3x3_kernel(%arg0: i32, %arg1: memref<1x256x64xf32, #tpu.memory_space<vmem>>, %arg2: memref<128x576xf32, #tpu.memory_space<vmem>>, %arg3: memref<128x1xf32, #tpu.memory_space<vmem>>, %arg4: memref<1x3x256xf32, #tpu.memory_space<vmem>>) attributes {dimension_semantics = [#tpu.dimension_semantics<parallel>], iteration_bounds = array<i64: 2>, scalar_prefetch = 0 : i64, scratch_operands = 0 : i64, tpu.core_type = #tpu.core_type<tc>, window_params = [{transform_indices = @transform_0, window_bounds = array<i64: 1, 256, 64>}, {pipeline_mode = #tpu.pipeline_mode<synchronous>, transform_indices = @transform_1, window_bounds = array<i64: 128, 576>}, {pipeline_mode = #tpu.pipeline_mode<synchronous>, transform_indices = @transform_2, window_bounds = array<i64: 128, 1>}, {transform_indices = @transform_3, window_bounds = array<i64: 1, 3, 256>}]} {
    %c0 = arith.constant 0 : index
    %c0_0 = arith.constant 0 : index
    %c0_1 = arith.constant 0 : index
    %0 = vector.load %arg1[%c0, %c0_0, %c0_1] : memref<1x256x64xf32, #tpu.memory_space<vmem>>, vector<1x256x64xf32>
    %1 = vector.shape_cast %0 : vector<1x256x64xf32> to vector<256x64xf32>
    %2 = tpu.transpose %1, [1, 0] : vector<256x64xf32> -> vector<64x256xf32>
    %cst = arith.constant 0.000000e+00 : f32
    %3 = vector.broadcast %cst : f32 to vector<64x17xf32>
    %4 = tpu.concatenate %3, %2, %3 in 1 : vector<64x17xf32>, vector<64x256xf32>, vector<64x17xf32> -> vector<64x290xf32>
    %5 = tpu.iota {dimensions = array<i32: 1>} : vector<1x256xi32>
    %c16_i32 = arith.constant 16 : i32
    %c0_i32 = arith.constant 0 : i32
    %6 = arith.cmpi eq, %c16_i32, %c0_i32 : i32
    %c1_i32 = arith.constant 1 : i32
    %7 = arith.select %6, %c1_i32, %c16_i32 : i32
    %8 = vector.broadcast %7 : i32 to vector<1x256xi32>
    %9 = arith.remsi %5, %8 : vector<1x256xi32>
    %c0_i32_2 = arith.constant 0 : i32
    %10 = vector.broadcast %c0_i32_2 : i32 to vector<1x256xi32>
    %11 = arith.cmpi ne, %9, %10 : vector<1x256xi32>
    %c0_i32_3 = arith.constant 0 : i32
    %12 = vector.broadcast %c0_i32_3 : i32 to vector<1x256xi32>
    %13 = arith.cmpi slt, %9, %12 : vector<1x256xi32>
    %c0_i32_4 = arith.constant 0 : i32
    %14 = arith.cmpi slt, %7, %c0_i32_4 : i32
    %15 = vector.broadcast %14 : i1 to vector<1x256xi1>
    %16 = vector.broadcast %15 : vector<1x256xi1> to vector<1x256xi1>
    %17 = arith.xori %13, %16 : vector<1x256xi1>
    %18 = arith.andi %17, %11 : vector<1x256xi1>
    %19 = vector.broadcast %7 : i32 to vector<1x256xi32>
    %20 = arith.addi %9, %19 : vector<1x256xi32>
    %21 = arith.select %18, %20, %9 : vector<1x256xi1>, vector<1x256xi32>
    %c0_i32_5 = arith.constant 0 : i32
    %22 = vector.broadcast %c0_i32_5 : i32 to vector<1x256xi32>
    %23 = arith.cmpi ne, %21, %22 : vector<1x256xi32>
    %c15_i32 = arith.constant 15 : i32
    %24 = vector.broadcast %c15_i32 : i32 to vector<1x256xi32>
    %25 = arith.cmpi ne, %21, %24 : vector<1x256xi32>
    %26 = vector.extract_strided_slice %4 {offsets = [0, 0], sizes = [64, 256], strides = [1, 1]} : vector<64x290xf32> to vector<64x256xf32>
    %cst_6 = arith.constant 0.000000e+00 : f32
    %27 = vector.shape_cast %23 : vector<1x256xi1> to vector<1x256xi1>
    %28 = vector.broadcast %27 : vector<1x256xi1> to vector<64x256xi1>
    %29 = vector.broadcast %cst_6 : f32 to vector<64x256xf32>
    %30 = arith.select %28, %26, %29 : vector<64x256xi1>, vector<64x256xf32>
    %31 = vector.extract_strided_slice %4 {offsets = [0, 1], sizes = [64, 256], strides = [1, 1]} : vector<64x290xf32> to vector<64x256xf32>
    %32 = vector.extract_strided_slice %4 {offsets = [0, 2], sizes = [64, 256], strides = [1, 1]} : vector<64x290xf32> to vector<64x256xf32>
    %cst_7 = arith.constant 0.000000e+00 : f32
    %33 = vector.shape_cast %25 : vector<1x256xi1> to vector<1x256xi1>
    %34 = vector.broadcast %33 : vector<1x256xi1> to vector<64x256xi1>
    %35 = vector.broadcast %cst_7 : f32 to vector<64x256xf32>
    %36 = arith.select %34, %32, %35 : vector<64x256xi1>, vector<64x256xf32>
    %37 = vector.extract_strided_slice %4 {offsets = [0, 16], sizes = [64, 256], strides = [1, 1]} : vector<64x290xf32> to vector<64x256xf32>
    %cst_8 = arith.constant 0.000000e+00 : f32
    %38 = vector.shape_cast %23 : vector<1x256xi1> to vector<1x256xi1>
    %39 = vector.broadcast %38 : vector<1x256xi1> to vector<64x256xi1>
    %40 = vector.broadcast %cst_8 : f32 to vector<64x256xf32>
    %41 = arith.select %39, %37, %40 : vector<64x256xi1>, vector<64x256xf32>
    %42 = vector.extract_strided_slice %4 {offsets = [0, 17], sizes = [64, 256], strides = [1, 1]} : vector<64x290xf32> to vector<64x256xf32>
    %43 = vector.extract_strided_slice %4 {offsets = [0, 18], sizes = [64, 256], strides = [1, 1]} : vector<64x290xf32> to vector<64x256xf32>
    %cst_9 = arith.constant 0.000000e+00 : f32
    %44 = vector.shape_cast %25 : vector<1x256xi1> to vector<1x256xi1>
    %45 = vector.broadcast %44 : vector<1x256xi1> to vector<64x256xi1>
    %46 = vector.broadcast %cst_9 : f32 to vector<64x256xf32>
    %47 = arith.select %45, %43, %46 : vector<64x256xi1>, vector<64x256xf32>
    %48 = vector.extract_strided_slice %4 {offsets = [0, 32], sizes = [64, 256], strides = [1, 1]} : vector<64x290xf32> to vector<64x256xf32>
    %cst_10 = arith.constant 0.000000e+00 : f32
    %49 = vector.shape_cast %23 : vector<1x256xi1> to vector<1x256xi1>
    %50 = vector.broadcast %49 : vector<1x256xi1> to vector<64x256xi1>
    %51 = vector.broadcast %cst_10 : f32 to vector<64x256xf32>
    %52 = arith.select %50, %48, %51 : vector<64x256xi1>, vector<64x256xf32>
    %53 = vector.extract_strided_slice %4 {offsets = [0, 33], sizes = [64, 256], strides = [1, 1]} : vector<64x290xf32> to vector<64x256xf32>
    %54 = vector.extract_strided_slice %4 {offsets = [0, 34], sizes = [64, 256], strides = [1, 1]} : vector<64x290xf32> to vector<64x256xf32>
    %cst_11 = arith.constant 0.000000e+00 : f32
    %55 = vector.shape_cast %25 : vector<1x256xi1> to vector<1x256xi1>
    %56 = vector.broadcast %55 : vector<1x256xi1> to vector<64x256xi1>
    %57 = vector.broadcast %cst_11 : f32 to vector<64x256xf32>
    %58 = arith.select %56, %54, %57 : vector<64x256xi1>, vector<64x256xf32>
    %59 = tpu.concatenate %30, %31, %36, %41, %42, %47, %52, %53, %58 in 0 : vector<64x256xf32>, vector<64x256xf32>, vector<64x256xf32>, vector<64x256xf32>, vector<64x256xf32>, vector<64x256xf32>, vector<64x256xf32>, vector<64x256xf32>, vector<64x256xf32> -> vector<576x256xf32>
    %c0_12 = arith.constant 0 : index
    %c0_13 = arith.constant 0 : index
    %60 = vector.load %arg2[%c0_12, %c0_13] : memref<128x576xf32, #tpu.memory_space<vmem>>, vector<128x576xf32>
    %cst_14 = arith.constant dense<0.000000e+00> : vector<128x256xf32>
    %61 = tpu.matmul %60, %59, %cst_14 {dimension_numbers = #tpu.dot_dimension_numbers<[1], [0], [0], [1], [0, 0, 1, 1], [], []>} : vector<128x576xf32>, vector<576x256xf32>, vector<128x256xf32> -> vector<128x256xf32>
    %c0_15 = arith.constant 0 : index
    %c0_16 = arith.constant 0 : index
    %62 = vector.load %arg3[%c0_15, %c0_16] : memref<128x1xf32, #tpu.memory_space<vmem>>, vector<128x1xf32>
    %63 = vector.broadcast %62 : vector<128x1xf32> to vector<128x256xf32>
    %64 = arith.addf %61, %63 : vector<128x256xf32>
    %65 = vector.extract_strided_slice %64 {offsets = [0, 0], sizes = [3, 256], strides = [1, 1]} : vector<128x256xf32> to vector<3x256xf32>
    %c0_17 = arith.constant 0 : index
    %c0_18 = arith.constant 0 : index
    %c0_19 = arith.constant 0 : index
    %66 = vector.load %arg4[%c0_17, %c0_18, %c0_19] : memref<1x3x256xf32, #tpu.memory_space<vmem>>, vector<1x3x256xf32>
    %67 = vector.shape_cast %66 : vector<1x3x256xf32> to vector<3x256xf32>
    %68 = vector.shape_cast %65 : vector<3x256xf32> to vector<1x3x256xf32>
    tpu.vector_store %arg4[%c0_17, %c0_18, %c0_19], %68 {strides = array<i32>} : memref<1x3x256xf32, #tpu.memory_space<vmem>>, vector<1x3x256xf32>,
    return
  }
  func.func @transform_0(%arg0: i32) -> (i32, i32, i32) {
    %c0_i32 = arith.constant 0 : i32
    %c0_i32_0 = arith.constant 0 : i32
    %c0_i32_1 = arith.constant 0 : i32
    return %arg0, %c0_i32, %c0_i32_0 : i32, i32, i32
  }
  func.func @transform_1(%arg0: i32) -> (i32, i32) {
    %c0_i32 = arith.constant 0 : i32
    %c0_i32_0 = arith.constant 0 : i32
    %c0_i32_1 = arith.constant 0 : i32
    return %c0_i32, %c0_i32_0 : i32, i32
  }
  func.func @transform_2(%arg0: i32) -> (i32, i32) {
    %c0_i32 = arith.constant 0 : i32
    %c0_i32_0 = arith.constant 0 : i32
    %c0_i32_1 = arith.constant 0 : i32
    return %c0_i32, %c0_i32_0 : i32, i32
  }
  func.func @transform_3(%arg0: i32) -> (i32, i32, i32) {
    %c0_i32 = arith.constant 0 : i32
    %c0_i32_0 = arith.constant 0 : i32
    %c0_i32_1 = arith.constant 0 : i32
    return %arg0, %c0_i32, %c0_i32_0 : i32, i32, i32
  }
}

</mosaic_0001>

<bundles_post_ra>
// kernel: tpu_custom_call.1
= control target key start
LH: loop header
LB: loop body
LE: loop exit
PB: predicated region body
PF: predicated region fallthrough
CT: control target
= control target key end

     0   :  { %s2832_s12 = smov 0   ;;  %s4093_s0 = inlined_call_operand.vmem [shape: f32[2,256,64], index: 0, kind: input, shape index: {}]   ;;  %s4094_s1 = inlined_call_operand.vmem [shape: f32[128,576], index: 1, kind: input, shape index: {}]   ;;  %s4095_s2 = inlined_call_operand.vmem [shape: f32[128,1], index: 2, kind: input, shape index: {}]   ;;  %s4096_s3 = inlined_call_operand.vmem [shape: f32[2,3,256], index: 3, kind: output, shape index: {}]  }
   0x1 LB: > { %s1826_s13 = sadd.s32 4294967295, %s2799_s12   ;;  %p1830_p0 = scmp.ge.s32.totalorder %s2799_s12, 1  ;;  %s2799_s12 = sphi %s2832_s12, %s13_s12  }
   0x2   : > { %p137_p1 = scmp.lt.s32.totalorder %s2799_s12, 3 }
   0x4   : > { %p138_p2 = pnand %p1830_p0, %p137_p1 }
   0x6   : > { %141 = sbr.rel (%p138_p2) target bundleno = 899 (0x383), region = 32 }
   0xd   : > { %p161_p3 = scmp.lt.s32.totalorder %s1826_s13, 1  ;;  %s2801_s18 = smov 17   ;;  %v364_v56 = vlaneseq  ;;  %vm315_vm0 = vcmask 138240   ;;  %vm1049_vm5 = vcmask 908288   ;;  %vm483_vm6 = vcmask 1031168  }
   0xe   : > { %s2802_s19 = smov 126   ;;  %s2803_s20 = smov 111   ;;  %vm580_vm7 = vcmask 916480   ;;  %vm968_vm8 = vcmask 1039360   ;;  %vm774_vm9 = vcmask 785408   ;;  %vm1130_vm10 = vcmask 777216  }
   0xf   : > { %s4167_s13 = smov (!%p161_p3, %s1826_s13), 1  ;;  %v2880_v57 = vand.u32 127, %v364_v56  ;;  %s2804_s21 = smov 96   ;;  %vm677_vm11 = vcmask 900096  }
  0x10   : > { %s1949_s14 = sshll.u32 %s4167_s13, 8  ;;  %s2805_s22 = smov 110  }
  0x11   : > { %s2846_s17 = scalar_lea.vmem %s4093_s0, %s1949_s14  ;;  %v2883_v58 = vadd.s32 128, %v2880_v57  ;;  %v4097_v63 = vand.u32 15, %v2880_v57  ;;  %s2806_s23 = smov 112  }
  0x12   : > { %v171_v0 = vld [vmem:[%s2846_s17] sm:$0xff]  ;;  %v172_v2 = vld [vmem:[%s2846_s17 + $0x8] sm:$0xff]  ;;  %v173_v6 = vld [vmem:[%s2846_s17 + $0x10] sm:$0xff]  ;;  %s2807_s24 = smov 127   ;;  %s2808_s25 = smov 95  }
  0x13   : > { %v187_v1 = vld [vmem:[%s2846_s17 + $0x80] sm:$0xff]  ;;  %v188_v4 = vld [vmem:[%s2846_s17 + $0x88] sm:$0xff]  ;;  %v189_v7 = vld [vmem:[%s2846_s17 + $0x90] sm:$0xff]  ;;  %v4098_v62 = vand.u32 15, %v2883_v58  ;;  %vm391_vm2 = vcmp.ne.s32.totalorder %v4097_v63, 0  ;;  %s2809_s26 = smov 94  }
  0x14   : > { %v2200_v3 = vpack.i.bf16 %v187_v1, %v171_v0  ;;  %v2202_v5 = vpack.i.bf16 %v188_v4, %v172_v2  ;;  %v2204_v8 = vpack.i.bf16 %v189_v7, %v173_v6  ;;  %v174_v9 = vld [vmem:[%s2846_s17 + $0x18] sm:$0xff]  ;;  %v175_v12 = vld [vmem:[%s2846_s17 + $0x20] sm:$0xff]  ;;  %v176_v15 = vld [vmem:[%s2846_s17 + $0x28] sm:$0xff]  ;;  %s1950_s14 = sshll.u32 %s4167_s13, 3 }
  0x15   : > { %v190_v10 = vld [vmem:[%s2846_s17 + $0x98] sm:$0xff]  ;;  %v191_v13 = vld [vmem:[%s2846_s17 + $0xa0] sm:$0xff]  ;;  %v192_v16 = vld [vmem:[%s2846_s17 + $0xa8] sm:$0xff]  ;;  %vm392_vm1 = vcmp.ne.s32.totalorder %v4098_v62, 0 }
  0x16   : > { %2201 = vxpose.xlu0.b32.start [1/16] (narrow) %v2200_v3, 64  ;;  %v2206_v11 = vpack.i.bf16 %v190_v10, %v174_v9  ;;  %v2208_v14 = vpack.i.bf16 %v191_v13, %v175_v12  ;;  %v2210_v17 = vpack.i.bf16 %v192_v16, %v176_v15  ;;  %v177_v18 = vld [vmem:[%s2846_s17 + $0x30] sm:$0xff]  ;;  %v178_v21 = vld [vmem:[%s2846_s17 + $0x38] sm:$0xff]  ;;  %v179_v24 = vld [vmem:[%s2846_s17 + $0x40] sm:$0xff] }
  0x17   : > { %v193_v19 = vld [vmem:[%s2846_s17 + $0xb0] sm:$0xff]  ;;  %v194_v22 = vld [vmem:[%s2846_s17 + $0xb8] sm:$0xff]  ;;  %v195_v25 = vld [vmem:[%s2846_s17 + $0xc0] sm:$0xff] }
  0x18   : > { %v2212_v20 = vpack.i.bf16 %v193_v19, %v177_v18  ;;  %v2214_v23 = vpack.i.bf16 %v194_v22, %v178_v21  ;;  %v2216_v26 = vpack.i.bf16 %v195_v25, %v179_v24  ;;  %v180_v27 = vld [vmem:[%s2846_s17 + $0x48] sm:$0xff]  ;;  %v181_v30 = vld [vmem:[%s2846_s17 + $0x50] sm:$0xff]  ;;  %v182_v33 = vld [vmem:[%s2846_s17 + $0x58] sm:$0xff] }
  0x19   : > { %v196_v28 = vld [vmem:[%s2846_s17 + $0xc8] sm:$0xff]  ;;  %v197_v31 = vld [vmem:[%s2846_s17 + $0xd0] sm:$0xff]  ;;  %v198_v34 = vld [vmem:[%s2846_s17 + $0xd8] sm:$0xff] }
  0x1a   : > { %2203 = vxpose.xlu0.b32.cont [2/16] (narrow) %v2202_v5, 64  ;;  %v2218_v29 = vpack.i.bf16 %v196_v28, %v180_v27  ;;  %v2220_v32 = vpack.i.bf16 %v197_v31, %v181_v30  ;;  %v2222_v35 = vpack.i.bf16 %v198_v34, %v182_v33  ;;  %v183_v36 = vld [vmem:[%s2846_s17 + $0x60] sm:$0xff]  ;;  %v184_v39 = vld [vmem:[%s2846_s17 + $0x68] sm:$0xff]  ;;  %v185_v42 = vld [vmem:[%s2846_s17 + $0x70] sm:$0xff] }
  0x1b   : > { %v199_v37 = vld [vmem:[%s2846_s17 + $0xe0] sm:$0xff]  ;;  %v200_v40 = vld [vmem:[%s2846_s17 + $0xe8] sm:$0xff]  ;;  %v201_v43 = vld [vmem:[%s2846_s17 + $0xf0] sm:$0xff] }
  0x1c   : > { %v2224_v38 = vpack.i.bf16 %v199_v37, %v183_v36  ;;  %v2226_v41 = vpack.i.bf16 %v200_v40, %v184_v39  ;;  %v2228_v44 = vpack.i.bf16 %v201_v43, %v185_v42  ;;  %v186_v45 = vld [vmem:[%s2846_s17 + $0x78] sm:$0xff]  ;;  %vm2902_vm3 = vmpackc.low %vm392_vm1, %vm392_vm1  ;;  %vm1324_vm1 = vcmask 523264   ;;  %v1187_v10 = vld [vmem:[%s4094_s1 + $0xc0] sm:$0xff] }
  0x1d   : > { %v202_v46 = vld [vmem:[%s2846_s17 + $0xf8] sm:$0xff]  ;;  %vm2906_vm4 = vmpackc.low %vm391_vm2, %vm391_vm2  ;;  %v1228_v13 = vld [vmem:[%s4094_s1 + $0x208] sm:$0xff]  ;;  %s170_s17 = scalar_lea.vmem %s4096_s3, %s1950_s14 }
  0x1e   : > { %2205 = vxpose.xlu0.b32.cont [3/16] (narrow) %v2204_v8, 64  ;;  %v2230_v47 = vpack.i.bf16 %v202_v46, %v186_v45 }
  0x22   : > { %2207 = vxpose.xlu0.b32.cont [4/16] (narrow) %v2206_v11, 64 }
  0x26   : > { %2209 = vxpose.xlu0.b32.cont [5/16] (narrow) %v2208_v14, 64 }
  0x2a   : > { %2211 = vxpose.xlu0.b32.cont [6/16] (narrow) %v2210_v17, 64 }
  0x2e   : > { %2213 = vxpose.xlu0.b32.cont [7/16] (narrow) %v2212_v20, 64 }
  0x32   : > { %2215 = vxpose.xlu0.b32.cont [8/16] (narrow) %v2214_v23, 64 }
  0x36   : > { %2217 = vxpose.xlu0.b32.cont [9/16] (narrow) %v2216_v26, 64 }
  0x3a   : > { %2219 = vxpose.xlu0.b32.cont [10/16] (narrow) %v2218_v29, 64 }
  0x3e   : > { %2221 = vxpose.xlu0.b32.cont [11/16] (narrow) %v2220_v32, 64 }
  0x42   : > { %2223 = vxpose.xlu0.b32.cont [12/16] (narrow) %v2222_v35, 64 }
  0x46   : > { %2225 = vxpose.xlu0.b32.cont [13/16] (narrow) %v2224_v38, 64 }
  0x4a   : > { %2227 = vxpose.xlu0.b32.cont [14/16] (narrow) %v2226_v41, 64 }
  0x4e   : > { %2229 = vxpose.xlu0.b32.cont [15/16] (narrow) %v2228_v44, 64 }
  0x52   : > { %2231 = vxpose.xlu0.b32.end [16/16] (narrow) %v2230_v47, 64 }
  0x96   : > { %v2232_v48 = vpop.trf.xlu0 }
  0x97   : > { %2273 = vrot.lane.b32.xlu1 %v2232_v48, %s2801_s18 }
  0x9a   : > { %v2237_v49 = vpop.trf.xlu0 }
  0x9b   : > { %2278 = vrot.lane.b32.xlu1 %v2237_v49, %s2801_s18 }
  0x9e   : > { %v2242_v50 = vpop.trf.xlu0 }
  0x9f   : > { %2283 = vrot.lane.b32.xlu1 %v2242_v50, %s2801_s18 }
  0xa2   : > { %v2247_v51 = vpop.trf.xlu0 }
  0xa3   : > { %2288 = vrot.lane.b32.xlu1 %v2247_v51, %s2801_s18 }
  0xa6   : > { %v2252_v52 = vpop.trf.xlu0 }
  0xa7   : > { %2293 = vrot.lane.b32.xlu1 %v2252_v52, %s2801_s18 }
  0xaa   : > { %v2257_v53 = vpop.trf.xlu0 }
  0xab   : > { %2298 = vrot.lane.b32.xlu1 %v2257_v53, %s2801_s18 }
  0xae   : > { %v2262_v54 = vpop.trf.xlu0 }
  0xaf   : > { %2303 = vrot.lane.b32.xlu1 %v2262_v54, %s2801_s18 }
  0xb2   : > { %v2267_v55 = vpop.trf.xlu0 }
  0xb3   : > { %2308 = vrot.lane.b32.xlu1 %v2267_v55, %s2801_s18 }
 0x109   : > { %v2274_v59 = vpop.permute.xlu1 %2273 }
 0x10a   : > { %v2276_v60 = vunpack.i.h.bf16 %v2274_v59  ;;  %v2275_v61 = vunpack.i.l.bf16 %v2274_v59 }
 0x10c   : > { %v356_v0 = vsel %vm315_vm0, %v2276_v60, 0.0  ;;  %v316_v1 = vsel %vm315_vm0, %v2275_v61, %v2276_v60  ;;  %v348_v6 = vsel %vm315_vm0, 0.0, %v2275_v61 }
 0x10d   : > { %v2279_v2 = vpop.permute.xlu1 %2278  ;;  %v2889_v3 = vpack.i.bf16 %v356_v0, %v316_v1 }
 0x10e   : > { %v2281_v4 = vunpack.i.h.bf16 %v2279_v2  ;;  %v2280_v5 = vunpack.i.l.bf16 %v2279_v2 }
 0x10f   : > { %2328 = vrot.lane.b32.xlu0 %v2889_v3, %s2802_s19  ;;  %2313 = vrot.lane.b32.xlu1 %v2889_v3, %s2803_s20 }
 0x110   : > { %v317_v7 = vsel %vm315_vm0, %v2280_v5, %v2281_v4  ;;  %v349_v8 = vsel %vm315_vm0, 0.0, %v2280_v5  ;;  %v357_v14 = vsel %vm315_vm0, %v2281_v4, 0.0 }
 0x111   : > { %v1951_v9 = vpack.c.bf16 %v317_v7, %v316_v1  ;;  %v1954_v11 = vpack.c.bf16 %v349_v8, %v348_v6  ;;  %v2284_v12 = vpop.permute.xlu1 %2283  ;;  %v2923_v20 = vpack.i.bf16 %v357_v14, %v317_v7  ;;  %v2934_v29 = vpack.i.bf16 %v349_v8, %v348_v6 }
 0x112   : > { %v2286_v15 = vunpack.i.h.bf16 %v2284_v12  ;;  %v2285_v16 = vunpack.i.l.bf16 %v2284_v12 }
 0x113   : > { %2333 = vrot.lane.b32.xlu0 %v2889_v3, %s2804_s21  ;;  %2318 = vrot.lane.b32.xlu1 %v2889_v3, %s2805_s22 }
 0x114   : > { %1953 = vmatprep.subr.msk.bf16.mxu1 %vm2902_vm3, %v1951_v9  ;;  %v318_v21 = vsel %vm315_vm0, %v2285_v16, %v2286_v15  ;;  %v350_v23 = vsel %vm315_vm0, 0.0, %v2285_v16  ;;  %v358_v37 = vsel %vm315_vm0, %v2286_v15, 0.0 }
 0x115   : > { %1956 = vmatpush1.bf16.msk.msra.mxu1 %vm2906_vm4, %v1954_v11  ;;  %v2289_v17 = vpop.permute.xlu1 %2288  ;;  %v2958_v47 = vpack.i.bf16 %v358_v37, %v318_v21 }
 0x116   : > { %v2291_v18 = vunpack.i.h.bf16 %v2289_v17  ;;  %v2290_v19 = vunpack.i.l.bf16 %v2289_v17 }
 0x117   : > { %2338 = vrot.lane.b32.xlu0 %v2889_v3, %s2806_s23  ;;  %2323 = vrot.lane.b32.xlu1 %v2889_v3, %s2807_s24 }
 0x118   : > { %v319_v22 = vsel %vm315_vm0, %v2290_v19, %v2291_v18  ;;  %v351_v24 = vsel %vm315_vm0, 0.0, %v2290_v19  ;;  %v359_v28 = vsel %vm315_vm0, %v2291_v18, 0.0 }
 0x119   : > { %v2294_v25 = vpop.permute.xlu1 %2293  ;;  %v1957_v26 = vpack.c.bf16 %v319_v22, %v318_v21  ;;  %v1960_v27 = vpack.c.bf16 %v351_v24, %v350_v23  ;;  %v2940_v35 = vpack.i.bf16 %v359_v28, %v319_v22  ;;  %v2942_v36 = vpack.i.bf16 %v351_v24, %v350_v23 }
 0x11a   : > { %v2296_v30 = vunpack.i.h.bf16 %v2294_v25  ;;  %v2295_v31 = vunpack.i.l.bf16 %v2294_v25 }
 0x11b   : > { %2343 = vrot.lane.b32.xlu0 %v2889_v3, %s2808_s25  ;;  %2348 = vrot.lane.b32.xlu1 %v2923_v20, %s2803_s20 }
 0x11c   : > { %1959 = vmatprep.subr.msk.bf16.mxu1 %vm2902_vm3, %v1957_v26  ;;  %v320_v40 = vsel %vm315_vm0, %v2295_v31, %v2296_v30  ;;  %v352_v41 = vsel %vm315_vm0, 0.0, %v2295_v31  ;;  %v360_v5 = vsel %vm315_vm0, %v2296_v30, 0.0 }
 0x11d   : > { %1962 = vmatpush1.bf16.msk.msra.mxu1 %vm2906_vm4, %v1960_v27  ;;  %v2299_v32 = vpop.permute.xlu1 %2298  ;;  %v2989_v6 = vpack.i.bf16 %v360_v5, %v320_v40 }
 0x11e   : > { %v2301_v33 = vunpack.i.h.bf16 %v2299_v32  ;;  %v2300_v34 = vunpack.i.l.bf16 %v2299_v32 }
 0x11f   : > { %2388 = vrot.lane.b32.xlu0 %v2934_v29, %s2802_s19  ;;  %2353 = vrot.lane.b32.xlu1 %v2934_v29, %s2803_s20 }
 0x120   : > { %v361_v38 = vsel %vm315_vm0, %v2301_v33, 0.0  ;;  %v321_v39 = vsel %vm315_vm0, %v2300_v34, %v2301_v33  ;;  %v353_v43 = vsel %vm315_vm0, 0.0, %v2300_v34 }
 0x121   : > { %v2304_v42 = vpop.permute.xlu1 %2303  ;;  %v1963_v46 = vpack.c.bf16 %v321_v39, %v320_v40  ;;  %v1966_v48 = vpack.c.bf16 %v353_v43, %v352_v41  ;;  %v2967_v55 = vpack.i.bf16 %v361_v38, %v321_v39  ;;  %v2969_v56 = vpack.i.bf16 %v353_v43, %v352_v41 }
 0x122   : > { %v2306_v44 = vunpack.i.h.bf16 %v2304_v42  ;;  %v2305_v45 = vunpack.i.l.bf16 %v2304_v42 }
 0x123   : > { %2408 = vrot.lane.b32.xlu0 %v2934_v29, %s2806_s23  ;;  %2358 = vrot.lane.b32.xlu1 %v2923_v20, %s2805_s22 }
 0x124   : > { %1965 = vmatprep.subr.msk.bf16.mxu1 %vm2902_vm3, %v1963_v46  ;;  %v362_v49 = vsel %vm315_vm0, %v2306_v44, 0.0  ;;  %v322_v50 = vsel %vm315_vm0, %v2305_v45, %v2306_v44  ;;  %v354_v51 = vsel %vm315_vm0, 0.0, %v2305_v45 }
 0x125   : > { %v2309_v52 = vpop.permute.xlu1 %2308  ;;  %1968 = vmatpush1.bf16.msk.msra.mxu1 %vm2906_vm4, %v1966_v48  ;;  %v2975_v59 = vpack.i.bf16 %v362_v49, %v322_v50 }
 0x126   : > { %v2311_v53 = vunpack.i.h.bf16 %v2309_v52  ;;  %v2310_v54 = vunpack.i.l.bf16 %v2309_v52 }
 0x127   : > { %2428 = vrot.lane.b32.xlu0 %v2958_v47, %s2807_s24  ;;  %2363 = vrot.lane.b32.xlu1 %v2923_v20, %s2807_s24 }
 0x128   : > { %v363_v60 = vsel %vm315_vm0, %v2311_v53, 0.0  ;;  %v323_v61 = vsel %vm315_vm0, %v2310_v54, %v2311_v53  ;;  %v355_v0 = vsel %vm315_vm0, 0.0, %v2310_v54  ;;  %vm871_vm0 = vcmask 769024  }
 0x129   : > { %v2980_v1 = vpack.i.bf16 %v355_v0, %v354_v51  ;;  %v1969_v2 = vpack.c.bf16 %v323_v61, %v322_v50  ;;  %v1972_v4 = vpack.c.bf16 %v355_v0, %v354_v51  ;;  %v2991_v7 = vpack.i.bf16 %v363_v60, %v323_v61 }
 0x12b   : > { %2433 = vrot.lane.b32.xlu0 %v2958_v47, %s2802_s19  ;;  %2368 = vrot.lane.b32.xlu1 %v2934_v29, %s2805_s22 }
 0x12c   : > { %1971 = vmatprep.subr.msk.bf16.mxu1 %vm2902_vm3, %v1969_v2 }
 0x12d   : > { %1974 = vmatpush1.bf16.msk.msra.mxu1 %vm2906_vm4, %v1972_v4 }
 0x12f   : > { %2438 = vrot.lane.b32.xlu0 %v2958_v47, %s2804_s21  ;;  %2373 = vrot.lane.b32.xlu1 %v2934_v29, %s2807_s24 }
 0x133   : > { %2443 = vrot.lane.b32.xlu0 %v2958_v47, %s2806_s23  ;;  %2378 = vrot.lane.b32.xlu1 %v2923_v20, %s2802_s19 }
 0x137   : > { %2448 = vrot.lane.b32.xlu0 %v2958_v47, %s2808_s25  ;;  %2383 = vrot.lane.b32.xlu1 %v2923_v20, %s2804_s21 }
 0x13b   : > { %2473 = vrot.lane.b32.xlu0 %v2942_v36, %s2805_s22  ;;  %2393 = vrot.lane.b32.xlu1 %v2934_v29, %s2804_s21 }
 0x13f   : > { %2493 = vrot.lane.b32.xlu0 %v2942_v36, %s2802_s19  ;;  %2398 = vrot.lane.b32.xlu1 %v2923_v20, %s2806_s23 }
 0x143   : > { %2518 = vrot.lane.b32.xlu0 %v2989_v6, %s2805_s22  ;;  %2403 = vrot.lane.b32.xlu1 %v2923_v20, %s2808_s25 }
 0x147   : > { %2523 = vrot.lane.b32.xlu0 %v2989_v6, %s2807_s24  ;;  %2413 = vrot.lane.b32.xlu1 %v2934_v29, %s2808_s25 }
 0x14b   : > { %2528 = vrot.lane.b32.xlu0 %v2989_v6, %s2802_s19  ;;  %2418 = vrot.lane.b32.xlu1 %v2958_v47, %s2803_s20 }
 0x14f   : > { %2533 = vrot.lane.b32.xlu0 %v2989_v6, %s2804_s21  ;;  %2423 = vrot.lane.b32.xlu1 %v2958_v47, %s2805_s22 }
 0x153   : > { %2543 = vrot.lane.b32.xlu0 %v2969_v56, %s2803_s20  ;;  %2453 = vrot.lane.b32.xlu1 %v2940_v35, %s2803_s20 }
 0x157   : > { %2558 = vrot.lane.b32.xlu0 %v2969_v56, %s2805_s22  ;;  %2458 = vrot.lane.b32.xlu1 %v2942_v36, %s2803_s20 }
 0x15b   : > { %2578 = vrot.lane.b32.xlu0 %v2969_v56, %s2802_s19  ;;  %2463 = vrot.lane.b32.xlu1 %v2940_v35, %s2805_s22 }
 0x15f   : > { %2593 = vrot.lane.b32.xlu0 %v2975_v59, %s2805_s22  ;;  %2468 = vrot.lane.b32.xlu1 %v2940_v35, %s2807_s24 }
 0x163   : > { %2598 = vrot.lane.b32.xlu0 %v2975_v59, %s2807_s24  ;;  %2478 = vrot.lane.b32.xlu1 %v2942_v36, %s2807_s24 }
 0x167   : > { %2603 = vrot.lane.b32.xlu0 %v2975_v59, %s2802_s19  ;;  %2483 = vrot.lane.b32.xlu1 %v2940_v35, %s2802_s19 }
 0x16b   : > { %2608 = vrot.lane.b32.xlu0 %v2975_v59, %s2804_s21  ;;  %2488 = vrot.lane.b32.xlu1 %v2940_v35, %s2804_s21 }
 0x16f   : > { %2633 = vrot.lane.b32.xlu0 %v2980_v1, %s2805_s22  ;;  %2498 = vrot.lane.b32.xlu1 %v2942_v36, %s2804_s21 }
 0x173   : > { %2638 = vrot.lane.b32.xlu0 %v2942_v36, %s2806_s23  ;;  %2503 = vrot.lane.b32.xlu1 %v2940_v35, %s2806_s23 }
 0x177   : > { %2648 = vrot.lane.b32.xlu0 %v2989_v6, %s2806_s23  ;;  %2508 = vrot.lane.b32.xlu1 %v2940_v35, %s2808_s25 }
 0x17b   : > { %2658 = vrot.lane.b32.xlu0 %v2989_v6, %s2808_s25  ;;  %2513 = vrot.lane.b32.xlu1 %v2989_v6, %s2803_s20 }
 0x17f   : > { %2683 = vrot.lane.b32.xlu0 %v2980_v1, %s2802_s19  ;;  %2538 = vrot.lane.b32.xlu1 %v2967_v55, %s2803_s20 }
 0x181   : > { %v3079_v8 = vpop.permute.xlu0 %2328  ;;  %v2314_v9 = vpop.permute.xlu1 %2313 }
 0x182   : > { %v2316_v16 = vunpack.i.h.bf16 %v2314_v9  ;;  %v2315_v17 = vunpack.i.l.bf16 %v2314_v9  ;;  %v2330_v28 = vunpack.i.l.bf16 %v3079_v8  ;;  %v2331_v0 = vunpack.i.h.bf16 %v3079_v8 }
 0x183   : > { %2688 = vrot.lane.b32.xlu0 %v2969_v56, %s2806_s23  ;;  %2548 = vrot.lane.b32.xlu1 %v2967_v55, %s2805_s22 }
 0x184   : > { %v1051_v23 = vsel %vm1049_vm5, %v2315_v17, %v2316_v16  ;;  %v3174_v8 = vsel %vm483_vm6, %v2330_v28, %v2331_v0 }
 0x185   : > { %v3085_v11 = vpop.permute.xlu0 %2333  ;;  %v3087_v12 = vpop.permute.xlu1 %2318 }
 0x187   : > { %2703 = vrot.lane.b32.xlu0 %v2975_v59, %s2806_s23  ;;  %2553 = vrot.lane.b32.xlu1 %v2967_v55, %s2807_s24 }
 0x189   : > { %v3093_v14 = vpop.permute.xlu0 %2338  ;;  %v3095_v15 = vpop.permute.xlu1 %2323 }
 0x18a   : > { %v2326_v42 = vunpack.i.h.bf16 %v3095_v15  ;;  %v2325_v43 = vunpack.i.l.bf16 %v3095_v15 }
 0x18b   : > { %2708 = vrot.lane.b32.xlu0 %v2975_v59, %s2808_s25  ;;  %2563 = vrot.lane.b32.xlu1 %v2969_v56, %s2807_s24 }
 0x18c   : > { %v970_v49 = vsel %vm968_vm8, %v2325_v43, %v2326_v42 }
 0x18d   : > { %v3101_v18 = vpop.permute.xlu0 %2343  ;;  %v2349_v19 = vpop.permute.xlu1 %2348 }
 0x18e   : > { %v2351_v21 = vunpack.i.h.bf16 %v2349_v19  ;;  %v2350_v22 = vunpack.i.l.bf16 %v2349_v19  ;;  %v2336_v19 = vunpack.i.h.bf16 %v3085_v11 }
 0x18f   : > { %2723 = vrot.lane.b32.xlu0 %v2980_v1, %s2806_s23  ;;  %2568 = vrot.lane.b32.xlu1 %v2967_v55, %s2802_s19 }
 0x190   : > { %v1053_v24 = vsel %vm1049_vm5, %v2350_v22, %v2351_v21  ;;  %v2335_v21 = vunpack.i.l.bf16 %v3085_v11 }
 0x191   : > { %v3109_v25 = vpop.permute.xlu0 %2388  ;;  %v2354_v26 = vpop.permute.xlu1 %2353  ;;  %v3111_v27 = vpack.c.bf16 %v1053_v24, %v1051_v23 }
 0x192   : > { %v2390_v30 = vunpack.i.l.bf16 %v3109_v25  ;;  %v2356_v31 = vunpack.i.h.bf16 %v2354_v26  ;;  %v2355_v32 = vunpack.i.l.bf16 %v2354_v26  ;;  %v2391_v15 = vunpack.i.h.bf16 %v3109_v25 }
 0x193   : > { %4120 = vst [vmem:[#allocation2_spill] sm:$0xff] %v3111_v27  ;;  %2733 = vrot.lane.b32.xlu0 %v2889_v3, %s2809_s26  ;;  %2573 = vrot.lane.b32.xlu1 %v2967_v55, %s2804_s21  ;;  %v2340_v3 = vunpack.i.l.bf16 %v3093_v14  ;;  %v776_v11 = vsel %vm774_vm9, %v2335_v21, %v2336_v19 }
 0x194   : > { %v3120_v33 = vsel %vm483_vm6, %v2390_v30, %v2330_v28  ;;  %2040 = vmatprep.subr.bf16.mxu0 %v3111_v27  ;;  %v1050_v34 = vsel %vm1049_vm5, %v2355_v32, %v2315_v17  ;;  %v1052_v37 = vsel %vm1049_vm5, %v2356_v31, %v2350_v22 }
 0x195   : > { %v3125_v38 = vpop.permute.xlu0 %2408  ;;  %v3127_v39 = vpop.permute.xlu1 %2358  ;;  %v3129_v40 = vpack.c.bf16 %v1052_v37, %v1050_v34 }
 0x196   : > { %v2410_v41 = vunpack.i.l.bf16 %v3125_v38 }
 0x197   : > { %4121 = vst [vmem:[#allocation3_spill] sm:$0xff] %v3129_v40  ;;  %2743 = vrot.lane.b32.xlu0 %v2934_v29, %s2809_s26  ;;  %2583 = vrot.lane.b32.xlu1 %v2969_v56, %s2804_s21 }
 0x198   : > { %v3142_v44 = vsel %vm580_vm7, %v2410_v41, %v2340_v3  ;;  %2042 = vmatpush1.bf16.msra.mxu0 %v3129_v40 }
 0x199   : > { %v3145_v45 = vpop.permute.xlu0 %2428  ;;  %v2364_v46 = vpop.permute.xlu1 %2363 }
 0x19a   : > { %v2366_v48 = vunpack.i.h.bf16 %v2364_v46  ;;  %v2365_v29 = vunpack.i.l.bf16 %v2364_v46  ;;  %v2341_v46 = vunpack.i.h.bf16 %v3093_v14 }
 0x19b   : > { %2753 = vrot.lane.b32.xlu0 %v2940_v35, %s2809_s26  ;;  %2588 = vrot.lane.b32.xlu1 %v2975_v59, %s2803_s20 }
 0x19c   : > { %v972_v50 = vsel %vm968_vm8, %v2365_v29, %v2366_v48 }
 0x19d   : > { %v3153_v51 = vpop.permute.xlu0 %2433  ;;  %v3155_v52 = vpop.permute.xlu1 %2368  ;;  %v1975_v53 = vpack.c.bf16 %v972_v50, %v970_v49 }
 0x19e   : > { %v2435_v48 = vunpack.i.l.bf16 %v3153_v51  ;;  %v2370_v27 = vunpack.i.l.bf16 %v3155_v52 }
 0x19f   : > { %2763 = vrot.lane.b32.xlu0 %v2989_v6, %s2809_s26  ;;  %2613 = vrot.lane.b32.xlu1 %v2991_v7, %s2803_s20 }
 0x1a0   : > { %1976 = vmatprep.subr.bf16.mxu1 %v1975_v53 }
 0x1a1   : > { %v3161_v35 = vpop.permute.xlu0 %2438  ;;  %v2374_v54 = vpop.permute.xlu1 %2373 }
 0x1a2   : > { %v2376_v60 = vunpack.i.h.bf16 %v2374_v54  ;;  %v2375_v61 = vunpack.i.l.bf16 %v2374_v54 }
 0x1a3   : > { %2773 = vrot.lane.b32.xlu0 %v2969_v56, %s2809_s26  ;;  %2618 = vrot.lane.b32.xlu1 %v2980_v1, %s2803_s20 }
 0x1a4   : > { %v969_v2 = vsel %vm968_vm8, %v2375_v61, %v2325_v43  ;;  %v971_v4 = vsel %vm968_vm8, %v2376_v60, %v2365_v29  ;;  %v2411_v60 = vunpack.i.h.bf16 %v3125_v38 }
 0x1a5   : > { %v3170_v5 = vpop.permute.xlu0 %2443  ;;  %v2379_v6 = vpop.permute.xlu1 %2378  ;;  %v1977_v9 = vpack.c.bf16 %v971_v4, %v969_v2  ;;  %v3217_v4 = vsel %vm580_vm7, %v2340_v3, %v2341_v46 }
 0x1a6   : > { %v2381_v16 = vunpack.i.h.bf16 %v2379_v6  ;;  %v2380_v17 = vunpack.i.l.bf16 %v2379_v6  ;;  %v2346_v6 = vunpack.i.h.bf16 %v3101_v18 }
 0x1a7   : > { %2783 = vrot.lane.b32.xlu0 %v2991_v7, %s2809_s26  ;;  %2623 = vrot.lane.b32.xlu1 %v2991_v7, %s2805_s22 }
 0x1a8   : > { %v3183_v22 = vsel %vm483_vm6, %v2391_v15, %v2380_v17  ;;  %v3186_v23 = vsel %vm483_vm6, %v2380_v17, %v2381_v16  ;;  %1978 = vmatpush1.bf16.msra.mxu1 %v1977_v9  ;;  %v2345_v9 = vunpack.i.l.bf16 %v3101_v18 }
 0x1a9   : > { %v3192_v26 = vpop.permute.xlu0 %2448  ;;  %v2384_v28 = vpop.permute.xlu1 %2383 }
 0x1aa   : > { %v2386_v30 = vunpack.i.h.bf16 %v2384_v28  ;;  %v2385_v31 = vunpack.i.l.bf16 %v2384_v28  ;;  %v1132_v28 = vsel %vm1130_vm10, %v2345_v9, %v2346_v6 }
 0x1ab   : > { %2628 = vrot.lane.b32.xlu1 %v2991_v7, %s2807_s24 }
 0x1ac   : > { %v778_v32 = vsel %vm774_vm9, %v2385_v31, %v2386_v30 }
 0x1ad   : > { %v3198_v34 = vpack.c.bf16 %v778_v32, %v776_v11  ;;  %v3200_v37 = vpop.permute.xlu0 %2473  ;;  %v2394_v41 = vpop.permute.xlu1 %2393 }
 0x1ae   : > { %v2396_v42 = vunpack.i.h.bf16 %v2394_v41  ;;  %v2395_v43 = vunpack.i.l.bf16 %v2394_v41 }
 0x1af   : > { %2643 = vrot.lane.b32.xlu1 %v2942_v36, %s2808_s25 }
 0x1b0   : > { %v775_v29 = vsel %vm774_vm9, %v2395_v43, %v2335_v21  ;;  %v777_v49 = vsel %vm774_vm9, %v2396_v42, %v2385_v31 }
 0x1b1   : > { %v3208_v50 = vpack.c.bf16 %v777_v49, %v775_v29  ;;  %v3210_v53 = vpop.permute.xlu0 %2493  ;;  %v2399_v54 = vpop.permute.xlu1 %2398 }
 0x1b2   : > { %v2495_v61 = vunpack.i.l.bf16 %v3210_v53  ;;  %v2401_v0 = vunpack.i.h.bf16 %v2399_v54  ;;  %v2400_v2 = vunpack.i.l.bf16 %v2399_v54 }
 0x1b3   : > { %2653 = vrot.lane.b32.xlu1 %v2967_v55, %s2806_s23 }
 0x1b4   : > { %v3226_v38 = vsel %vm483_vm6, %v2495_v61, %v2435_v48  ;;  %v3229_v15 = vsel %vm580_vm7, %v2411_v60, %v2400_v2  ;;  %v3232_v14 = vsel %vm580_vm7, %v2400_v2, %v2401_v0  ;;  %v2475_v0 = vunpack.i.l.bf16 %v3200_v37 }
 0x1b5   : > { %v3238_v17 = vpop.permute.xlu0 %2518  ;;  %v2404_v18 = vpop.permute.xlu1 %2403 }
 0x1b6   : > { %v2406_v19 = vunpack.i.h.bf16 %v2404_v18  ;;  %v2405_v21 = vunpack.i.l.bf16 %v2404_v18 }
 0x1b7   : > { %2663 = vrot.lane.b32.xlu1 %v2980_v1, %s2807_s24 }
 0x1b8   : > { %v1134_v30 = vsel %vm1130_vm10, %v2405_v21, %v2406_v19 }
 0x1b9   : > { %v3244_v31 = vpop.permute.xlu0 %2523  ;;  %v2414_v11 = vpop.permute.xlu1 %2413  ;;  %v3246_v32 = vpack.c.bf16 %v1134_v30, %v1132_v28 }
 0x1ba   : > { %v2416_v41 = vunpack.i.h.bf16 %v2414_v11  ;;  %v2415_v42 = vunpack.i.l.bf16 %v2414_v11 }
 0x1bb   : > { %2668 = vrot.lane.b32.xlu1 %v2967_v55, %s2808_s25 }
 0x1bc   : > { %v1131_v43 = vsel %vm1130_vm10, %v2415_v42, %v2345_v9  ;;  %v1133_v46 = vsel %vm1130_vm10, %v2416_v41, %v2405_v21 }
 0x1bd   : > { %v3252_v29 = vpop.permute.xlu0 %2528  ;;  %v2419_v49 = vpop.permute.xlu1 %2418  ;;  %v3254_v54 = vpack.c.bf16 %v1133_v46, %v1131_v43 }
 0x1be   : > { %v2421_v6 = vunpack.i.h.bf16 %v2419_v49  ;;  %v2420_v9 = vunpack.i.l.bf16 %v2419_v49 }
 0x1bf   : > { %2673 = vrot.lane.b32.xlu1 %v2991_v7, %s2802_s19 }
 0x1c0   : > { %v1055_v11 = vsel %vm1049_vm5, %v2420_v9, %v2421_v6 }
 0x1c1   : > { %v3258_v60 = vpop.permute.xlu0 %2533  ;;  %v2424_v61 = vpop.permute.xlu1 %2423 }
 0x1c2   : > { %v2425_v2 = vunpack.i.l.bf16 %v2424_v61 }
 0x1c3   : > { %2678 = vrot.lane.b32.xlu1 %v2991_v7, %s2804_s21 }
 0x1c4   : > { %v682_v18 = vsel %vm677_vm11, %v2475_v0, %v2425_v2  ;;  %v2426_v0 = vunpack.i.h.bf16 %v2424_v61 }
 0x1c5   : > { %v3264_v19 = vpop.permute.xlu0 %2543  ;;  %v2454_v21 = vpop.permute.xlu1 %2453 }
 0x1c6   : > { %v2456_v28 = vunpack.i.h.bf16 %v2454_v21  ;;  %v2455_v30 = vunpack.i.l.bf16 %v2454_v21 }
 0x1c7   : > { %2693 = vrot.lane.b32.xlu1 %v2980_v1, %s2804_s21 }
 0x1c8   : > { %v1057_v41 = vsel %vm1049_vm5, %v2455_v30, %v2456_v28 }
 0x1c9   : > { %v3270_v42 = vpop.permute.xlu0 %2558  ;;  %v2459_v43 = vpop.permute.xlu1 %2458  ;;  %v3272_v46 = vpack.c.bf16 %v1057_v41, %v1055_v11  ;;  %v2476_v11 = vunpack.i.h.bf16 %v3200_v37 }
 0x1ca   : > { %v2461_v49 = vunpack.i.h.bf16 %v2459_v43  ;;  %v2460_v16 = vunpack.i.l.bf16 %v2459_v43  ;;  %v2431_v43 = vunpack.i.h.bf16 %v3145_v45 }
 0x1cb   : > { %4122 = vst [vmem:[#allocation4_spill] sm:$0xff] %v3272_v46  ;;  %2698 = vrot.lane.b32.xlu1 %v2969_v56, %s2808_s25  ;;  %2044 = vmatprep.subr.bf16.mxu0 %v3272_v46  ;;  %v2430_v56 = vunpack.i.l.bf16 %v3145_v45 }
 0x1cc   : > { %v1054_v21 = vsel %vm1049_vm5, %v2460_v16, %v2420_v9  ;;  %v1056_v3 = vsel %vm1049_vm5, %v2461_v49, %v2455_v30  ;;  %v683_v16 = vsel %vm677_vm11, %v2425_v2, %v2426_v0 }
 0x1cd   : > { %v3279_v6 = vpop.permute.xlu0 %2578  ;;  %v2464_v28 = vpop.permute.xlu1 %2463  ;;  %v3281_v25 = vpack.c.bf16 %v1056_v3, %v1054_v21  ;;  %v1166_v21 = vld [vmem:[%s4094_s1 + $0x18] sm:$0xff]  ;;  %v974_v45 = vsel %vm968_vm8, %v2430_v56, %v2431_v43 }
 0x1ce   : > { %v2466_v41 = vunpack.i.h.bf16 %v2464_v28  ;;  %v2465_v24 = vunpack.i.l.bf16 %v2464_v28  ;;  %1568 = vmatprep.mubr.f32.mxu0 %v1166_v21 }
 0x1cf   : > { %4123 = vst [vmem:[#allocation5_spill] sm:$0xff] %v3281_v25  ;;  %2713 = vrot.lane.b32.xlu1 %v2991_v7, %s2806_s23  ;;  %2046 = vmatpush1.bf16.msra.mxu0 %v3281_v25 }
 0x1d0   : > { %v684_v61 = vsel %vm677_vm11, %v2476_v11, %v2465_v24  ;;  %v685_v3 = vsel %vm677_vm11, %v2465_v24, %v2466_v41  ;;  %v1164_v11 = vld [vmem:[%s4094_s1 + $0x8] sm:$0xff] }
 0x1d1   : > { %v3292_v9 = vpack.c.bf16 %v685_v3, %v683_v16  ;;  %v3294_v37 = vpack.c.bf16 %v684_v61, %v682_v18  ;;  %v3296_v30 = vpop.permute.xlu0 %2593  ;;  %v2469_v49 = vpop.permute.xlu1 %2468  ;;  %1437 = vmatprep.mubr.f32.mxu1 %v1164_v11  ;;  %v2436_v61 = vunpack.i.h.bf16 %v3153_v51 }
 0x1d2   : > { %v2471_v28 = vunpack.i.h.bf16 %v2469_v49  ;;  %v2470_v63 = vunpack.i.l.bf16 %v2469_v49 }
 0x1d3   : > { %4124 = vst [vmem:[#allocation6_spill] sm:$0xff] %v3292_v9  ;;  %2718 = vrot.lane.b32.xlu1 %v2991_v7, %s2808_s25 }
 0x1d4   : > { %v976_v24 = vsel %vm968_vm8, %v2470_v63, %v2471_v28  ;;  %v2496_v28 = vunpack.i.h.bf16 %v3210_v53 }
 0x1d5   : > { %v3305_v2 = vpop.permute.xlu0 %2598  ;;  %v2479_v18 = vpop.permute.xlu1 %2478  ;;  %v1979_v0 = vpack.c.bf16 %v976_v24, %v974_v45 }
 0x1d6   : > { %v2481_v41 = vunpack.i.h.bf16 %v2479_v18  ;;  %v2480_v16 = vunpack.i.l.bf16 %v2479_v18  ;;  %v3321_v18 = vsel %vm483_vm6, %v2435_v48, %v2436_v61 }
 0x1d7   : > { %2728 = vrot.lane.b32.xlu1 %v2980_v1, %s2808_s25  ;;  %1980 = vmatprep.subr.bf16.mxu1 %v1979_v0 }
 0x1d8   : > { %v973_v7 = vsel %vm968_vm8, %v2480_v16, %v2430_v56  ;;  %v975_v43 = vsel %vm968_vm8, %v2481_v41, %v2470_v63  ;;  %v2441_v56 = vunpack.i.h.bf16 %v3161_v35  ;;  %v2440_v63 = vunpack.i.l.bf16 %v3161_v35 }
 0x1d9   : > { %v3315_v3 = vpop.permute.xlu0 %2603  ;;  %v2484_v49 = vpop.permute.xlu1 %2483  ;;  %v1981_v21 = vpack.c.bf16 %v975_v43, %v973_v7 }
 0x1da   : > { %v2486_v45 = vunpack.i.h.bf16 %v2484_v49  ;;  %v2485_v24 = vunpack.i.l.bf16 %v2484_v49  ;;  %v780_v35 = vsel %vm774_vm9, %v2440_v63, %v2441_v56 }
 0x1db   : > { %2738 = vrot.lane.b32.xlu1 %v2923_v20, %s2809_s26  ;;  %1982 = vmatpush1.bf16.msra.mxu1 %v1981_v21 }
 0x1dc   : > { %v3328_v0 = vsel %vm483_vm6, %v2496_v28, %v2485_v24  ;;  %v3331_v53 = vsel %vm483_vm6, %v2485_v24, %v2486_v45  ;;  %v2446_v45 = vunpack.i.h.bf16 %v3170_v5  ;;  %v2445_v24 = vunpack.i.l.bf16 %v3170_v5 }
 0x1dd   : > { %v3337_v11 = vpop.permute.xlu0 %2608  ;;  %v2489_v20 = vpop.permute.xlu1 %2488  ;;  %v2451_v5 = vunpack.i.h.bf16 %v3192_v26 }
 0x1de   : > { %v2491_v41 = vunpack.i.h.bf16 %v2489_v20  ;;  %v2490_v16 = vunpack.i.l.bf16 %v2489_v20 }
 0x1df   : > { %2748 = vrot.lane.b32.xlu1 %v2958_v47, %s2809_s26 }
 0x1e0   : > { %v782_v61 = vsel %vm774_vm9, %v2490_v16, %v2491_v41 }
 0x1e1   : > { %v3343_v7 = vpack.c.bf16 %v782_v61, %v780_v35  ;;  %v3345_v43 = vpop.permute.xlu0 %2633  ;;  %v2499_v49 = vpop.permute.xlu1 %2498 }
 0x1e2   : > { %v2501_v21 = vunpack.i.h.bf16 %v2499_v49  ;;  %v2500_v28 = vunpack.i.l.bf16 %v2499_v49  ;;  %v3356_v49 = vsel %vm580_vm7, %v2445_v24, %v2446_v45  ;;  %v2546_v45 = vunpack.i.h.bf16 %v3264_v19 }
 0x1e3   : > { %2758 = vrot.lane.b32.xlu1 %v2942_v36, %s2809_s26  ;;  %4125 = vst [vmem:[#allocation7_spill] sm:$0xff] %v3356_v49  ;;  %v4100_v36 = vunpack.i.l.bf16 %v3192_v26 }
 0x1e4   : > { %v779_v47 = vsel %vm774_vm9, %v2500_v28, %v2440_v63  ;;  %v781_v56 = vsel %vm774_vm9, %v2501_v21, %v2490_v16 }
 0x1e5   : > { %v3353_v20 = vpack.c.bf16 %v781_v56, %v779_v47  ;;  %v2639_v41 = vpop.permute.xlu0 %2638  ;;  %v2504_v35 = vpop.permute.xlu1 %2503 }
 0x1e6   : > { %v2641_v61 = vunpack.i.h.bf16 %v2639_v41  ;;  %v2640_v48 = vunpack.i.l.bf16 %v2639_v41  ;;  %v2506_v51 = vunpack.i.h.bf16 %v2504_v35  ;;  %v2505_v62 = vunpack.i.l.bf16 %v2504_v35 }
 0x1e7   : > { %2768 = vrot.lane.b32.xlu1 %v2967_v55, %s2809_s26 }
 0x1e8   : > { %v3363_v63 = vsel %vm580_vm7, %v2640_v48, %v2445_v24  ;;  %v3366_v16 = vsel %vm580_vm7, %v2641_v61, %v2505_v62  ;;  %v3369_v21 = vsel %vm580_vm7, %v2505_v62, %v2506_v51  ;;  %v1136_v62 = vsel %vm1130_vm10, %v4100_v36, %v2451_v5 }
 0x1e9   : > { %4126 = vst [vmem:[#allocation8_spill] sm:$0xff] %v3363_v63  ;;  %4127 = vst [vmem:[#allocation9_spill] sm:$0xff] %v3366_v16  ;;  %v3375_v47 = vpop.permute.xlu1 %2508  ;;  %v3417_v40 = vpop.permute.xlu0 %2648 }
 0x1ea   : > { %v2511_v55 = vunpack.i.h.bf16 %v3375_v47  ;;  %v4101_v56 = vunpack.i.l.bf16 %v3375_v47 }
 0x1eb   : > { %2778 = vrot.lane.b32.xlu1 %v2975_v59, %s2809_s26  ;;  %v2545_v59 = vunpack.i.l.bf16 %v3264_v19  ;;  %v2526_v19 = vunpack.i.h.bf16 %v3244_v31 }
 0x1ec   : > { %v1138_v51 = vsel %vm1130_vm10, %v4101_v56, %v2511_v55 }
 0x1ed   : > { %v2514_v48 = vpop.permute.xlu1 %2513  ;;  %v3387_v24 = vpack.c.bf16 %v1138_v51, %v1136_v62  ;;  %v3432_v16 = vpop.permute.xlu0 %2658 }
 0x1ee   : > { %v2516_v41 = vunpack.i.h.bf16 %v2514_v48  ;;  %v2515_v35 = vunpack.i.l.bf16 %v2514_v48 }
 0x1ef   : > { %4128 = vst [vmem:[#allocation10_spill] sm:$0xff] %v3387_v24  ;;  %2788 = vrot.lane.b32.xlu1 %v2980_v1, %s2809_s26 }
 0x1f0   : > { %v1059_v5 = vsel %vm1049_vm5, %v2515_v35, %v2516_v41  ;;  %v1058_v55 = vsel %vm1049_vm5, %v2545_v59, %v2515_v35 }
 0x1f1   : > { %v2539_v61 = vpop.permute.xlu1 %2538 }
 0x1f2   : > { %v2541_v28 = vunpack.i.h.bf16 %v2539_v61  ;;  %v2540_v25 = vunpack.i.l.bf16 %v2539_v61  ;;  %v2525_v61 = vunpack.i.l.bf16 %v3244_v31 }
 0x1f4   : > { %v1061_v36 = vsel %vm1049_vm5, %v2540_v25, %v2541_v28  ;;  %v1060_v62 = vsel %vm1049_vm5, %v2546_v45, %v2540_v25  ;;  %v978_v35 = vsel %vm968_vm8, %v2525_v61, %v2526_v19 }
 0x1f5   : > { %v3397_v51 = vpop.permute.xlu1 %2548  ;;  %v3399_v1 = vpack.c.bf16 %v1061_v36, %v1059_v5  ;;  %v3401_v48 = vpack.c.bf16 %v1060_v62, %v1058_v55 }
 0x1f7   : > { %4129 = vst [vmem:[#allocation11_spill] sm:$0xff] %v3399_v1  ;;  %4130 = vst [vmem:[#allocation12_spill] sm:$0xff] %v3401_v48  ;;  %2048 = vmatprep.subr.bf16.mxu0 %v3399_v1 }
 0x1f8   : > { %2050 = vmatpush1.bf16.msra.mxu0 %v3401_v48 }
 0x1f9   : > { %v2554_v41 = vpop.permute.xlu1 %2553 }
 0x1fa   : > { %v2556_v28 = vunpack.i.h.bf16 %v2554_v41  ;;  %v2555_v56 = vunpack.i.l.bf16 %v2554_v41 }
 0x1fc   : > { %v980_v25 = vsel %vm968_vm8, %v2555_v56, %v2556_v28 }
 0x1fd   : > { %v2564_v45 = vpop.permute.xlu1 %2563  ;;  %v1983_v36 = vpack.c.bf16 %v980_v25, %v978_v35 }
 0x1fe   : > { %v2566_v59 = vunpack.i.h.bf16 %v2564_v45  ;;  %v2565_v5 = vunpack.i.l.bf16 %v2564_v45 }
 0x1ff   : > { %1984 = vmatprep.subr.bf16.mxu1 %v1983_v36 }
 0x200   : > { %v977_v55 = vsel %vm968_vm8, %v2565_v5, %v2525_v61  ;;  %v979_v62 = vsel %vm968_vm8, %v2566_v59, %v2555_v56  ;;  %v2361_v61 = vunpack.i.h.bf16 %v3127_v39  ;;  %v2360_v56 = vunpack.i.l.bf16 %v3127_v39 }
 0x201   : > { %v3411_v1 = vpop.permute.xlu1 %2568  ;;  %v1985_v31 = vpack.c.bf16 %v979_v62, %v977_v55  ;;  %v2321_v5 = vunpack.i.h.bf16 %v3087_v12  ;;  %v2320_v55 = vunpack.i.l.bf16 %v3087_v12 }
 0x203   : > { %1986 = vmatpush1.bf16.msra.mxu1 %v1985_v31 }
 0x205   : > { %v3413_v48 = vpop.permute.xlu1 %2573 }
 0x209   : > { %v3415_v41 = vpop.permute.xlu1 %2583 }
 0x20d   : > { %v2589_v19 = vpop.permute.xlu1 %2588 }
 0x20e   : > { %v2591_v46 = vunpack.i.h.bf16 %v2589_v19  ;;  %v2590_v28 = vunpack.i.l.bf16 %v2589_v19  ;;  %v4132_v19 = vand.u32 15, %v2883_v58 }
 0x210   : > { %v1063_v36 = vsel %vm1049_vm5, %v2590_v28, %v2591_v46  ;;  %vm394_vm12 = vcmp.ne.s32.totalorder %v4132_v19, 15  ;;  %v681_v46 = vsel %vm677_vm11, %v2360_v56, %v2361_v61  ;;  %v678_v61 = vsel %vm677_vm11, %v2370_v27, %v2320_v55  ;;  %v1203_v19 = vld [vmem:[%s4094_s1 + $0x140] sm:$0xff] }
 0x211   : > { %v2614_v35 = vpop.permute.xlu1 %2613  ;;  %vm3440_vm13 = vmpackc.low %vm394_vm12, %vm394_vm12  ;;  %v2521_v27 = vunpack.i.h.bf16 %v3238_v17 }
 0x212   : > { %v2616_v25 = vunpack.i.h.bf16 %v2614_v35  ;;  %v2615_v45 = vunpack.i.l.bf16 %v2614_v35  ;;  %v2371_v35 = vunpack.i.h.bf16 %v3155_v52  ;;  %v4136_v52 = vand.u32 15, %v2880_v57  ;;  %v1209_v57 = vld [vmem:[%s4094_s1 + $0x170] sm:$0xff] }
 0x214   : > { %v1065_v59 = vsel %vm1049_vm5, %v2615_v45, %v2616_v25  ;;  %vm393_vm14 = vcmp.ne.s32.totalorder %v4136_v52, 15  ;;  %v2561_v52 = vunpack.i.h.bf16 %v3270_v42 }
 0x215   : > { %v2619_v62 = vpop.permute.xlu1 %2618  ;;  %v3425_v31 = vpack.c.bf16 %v1065_v59, %v1063_v36  ;;  %v679_v36 = vsel %vm677_vm11, %v2320_v55, %v2321_v5  ;;  %v2600_v5 = vunpack.i.l.bf16 %v3305_v2  ;;  %vm3458_vm15 = vmpackc.low %vm393_vm14, %vm393_vm14  ;;  %v3464_v55 = vpop.permute.xlu0 %2683 }
 0x216   : > { %v2621_v63 = vunpack.i.h.bf16 %v2619_v62  ;;  %v2620_v39 = vunpack.i.l.bf16 %v2619_v62  ;;  %v680_v62 = vsel %vm677_vm11, %v2371_v35, %v2360_v56  ;;  %v2520_v56 = vunpack.i.l.bf16 %v3238_v17 }
 0x217   : > { %4131 = vst [vmem:[#allocation13_spill] sm:$0xff] %v3425_v31  ;;  %2052 = vmatprep.subr.bf16.mxu0 %v3425_v31  ;;  %v3448_v31 = vpack.c.bf16 %v681_v46, %v679_v36  ;;  %v3466_v35 = vpack.c.bf16 %v680_v62, %v678_v61 }
 0x218   : > { %v1062_v12 = vsel %vm1049_vm5, %v2620_v39, %v2590_v28  ;;  %v1064_v25 = vsel %vm1049_vm5, %v2621_v63, %v2615_v45  ;;  %v2551_v63 = vunpack.i.h.bf16 %v3397_v51  ;;  %v2550_v28 = vunpack.i.l.bf16 %v3397_v51 }
 0x219   : > { %v2624_v58 = vpop.permute.xlu1 %2623  ;;  %v3438_v59 = vpack.c.bf16 %v1064_v25, %v1062_v12  ;;  %4137 = vst [vmem:[#allocation15_spill] sm:$0xff] %v3448_v31  ;;  %v2601_v45 = vunpack.i.h.bf16 %v3305_v2  ;;  %4140 = vst [vmem:[#allocation16_spill] sm:$0xff] %v3466_v35  ;;  %v2560_v2 = vunpack.i.l.bf16 %v3270_v42  ;;  %v687_v62 = vsel %vm677_vm11, %v2520_v56, %v2521_v27  ;;  %v3486_v49 = vpop.permute.xlu0 %2688 }
 0x21a   : > { %v689_v12 = vsel %vm677_vm11, %v2550_v28, %v2551_v63  ;;  %v2626_v25 = vunpack.i.h.bf16 %v2624_v58  ;;  %v2625_v36 = vunpack.i.l.bf16 %v2624_v58  ;;  %v2596_v63 = vunpack.i.h.bf16 %v3296_v30 }
 0x21b   : > { %4133 = vst [vmem:[#allocation14_spill] sm:$0xff] %v3438_v59  ;;  %2054 = vmatpush1.bf16.msra.mxu0 %v3438_v59  ;;  %v982_v17 = vsel %vm968_vm8, %v2600_v5, %v2601_v45  ;;  %v2595_v58 = vunpack.i.l.bf16 %v3296_v30  ;;  %v3483_v59 = vpack.c.bf16 %v689_v12, %v687_v62  ;;  %v2636_v30 = vunpack.i.h.bf16 %v3345_v43 }
 0x21c   : > { %2057 = vmatprep.subr.msk.bf16.mxu0 %vm3440_vm13, %v3448_v31  ;;  %v693_v45 = vsel %vm677_vm11, %v2625_v36, %v2626_v25  ;;  %v2635_v27 = vunpack.i.l.bf16 %v3345_v43 }
 0x21d   : > { %v2629_v51 = vpop.permute.xlu1 %2628  ;;  %v691_v12 = vsel %vm677_vm11, %v2595_v58, %v2596_v63  ;;  %v2576_v63 = vunpack.i.h.bf16 %v3413_v48 }
 0x21e   : > { %v2631_v39 = vunpack.i.h.bf16 %v2629_v51  ;;  %v2630_v46 = vunpack.i.l.bf16 %v2629_v51 }
 0x21f   : > { %2060 = vmatpush1.bf16.msk.msra.mxu0 %vm3458_vm15, %v3466_v35  ;;  %v688_v35 = vsel %vm677_vm11, %v2561_v52, %v2550_v28  ;;  %v4141_v28 = vunpack.i.l.bf16 %v3192_v26  ;;  %v1243_v26 = vld [vmem:[%s4095_s2] sm:$0xff] }
 0x220   : > { %2063 = vmatprep.subr.msk.bf16.mxu0 %vm3440_vm13, %v3292_v9  ;;  %v984_v61 = vsel %vm968_vm8, %v2630_v46, %v2631_v39  ;;  %v686_v9 = vsel %vm677_vm11, %v2560_v2, %v2520_v56  ;;  %v4142_v39 = vunpack.i.l.bf16 %v3375_v47  ;;  %v2810_v2 = vmov 0   ;;  %v3523_v47 = vpop.permute.xlu0 %2703 }
 0x221   : > { %v2644_v51 = vpop.permute.xlu1 %2643  ;;  %v1987_v31 = vpack.c.bf16 %v984_v61, %v982_v17  ;;  %2792 = vset.pattern.permute.xlu0 %v2810_v2  ;;  %v3504_v25 = vpack.c.bf16 %v688_v35, %v686_v9  ;;  %v692_v17 = vsel %vm677_vm11, %v2636_v30, %v2625_v36  ;;  %v3511_v61 = vpack.c.bf16 %v693_v45, %v691_v12 }
 0x222   : > { %v2646_v42 = vunpack.i.h.bf16 %v2644_v51  ;;  %v2645_v24 = vunpack.i.l.bf16 %v2644_v51  ;;  %1261 = vperm.xlu0 %2792, %v1243_v26   ;;  %v690_v9 = vsel %vm677_vm11, %v2635_v27, %v2595_v58  ;;  %v2575_v51 = vunpack.i.l.bf16 %v3413_v48 }
 0x223   : > { %1988 = vmatprep.subr.bf16.mxu1 %v1987_v31  ;;  %2066 = vmatpush1.bf16.msk.msra.mxu0 %vm3458_vm15, %v3294_v37  ;;  %v2536_v45 = vunpack.i.h.bf16 %v3258_v60  ;;  %v2535_v30 = vunpack.i.l.bf16 %v3258_v60  ;;  %v2586_v48 = vunpack.i.h.bf16 %v3415_v41  ;;  %v2570_v2 = vunpack.i.l.bf16 %v3411_v1 }
 0x224   : > { %2069 = vmatprep.subr.msk.bf16.mxu0 %vm3440_vm13, %v3483_v59  ;;  %v1135_v56 = vsel %vm1130_vm10, %v2645_v24, %v4141_v28  ;;  %v1137_v31 = vsel %vm1130_vm10, %v2646_v42, %v4142_v39  ;;  %v3525_v24 = vpack.c.bf16 %v692_v17, %v690_v9  ;;  %v3543_v39 = vpop.permute.xlu0 %2708  ;;  %v4143_v60 = vpack.c.bf16 %v3186_v23, %v3174_v8 }
 0x225   : > { %v3506_v52 = vpop.permute.xlu1 %2653  ;;  %v3508_v43 = vpack.c.bf16 %v1137_v31, %v1135_v56  ;;  %v2585_v56 = vunpack.i.l.bf16 %v3415_v41  ;;  %v2571_v31 = vunpack.i.h.bf16 %v3411_v1  ;;  %v2531_v41 = vunpack.i.h.bf16 %v3252_v29 }
 0x226   : > { %v2530_v1 = vunpack.i.l.bf16 %v3252_v29  ;;  %v785_v8 = vsel %vm774_vm9, %v2586_v48, %v2575_v51  ;;  %v2580_v23 = vunpack.i.l.bf16 %v3279_v6  ;;  %v2581_v29 = vunpack.i.h.bf16 %v3279_v6 }
 0x227   : > { %2072 = vmatpush1.bf16.msk.msra.mxu0 %vm3458_vm15, %v3504_v25  ;;  %v783_v26 = vsel %vm774_vm9, %v2585_v56, %v2535_v30  ;;  %v495_v9 = vsel %vm483_vm6, %v2570_v2, %v2571_v31  ;;  %v2605_v6 = vunpack.i.l.bf16 %v3315_v3  ;;  %v4146_v31 = vpack.c.bf16 %v3328_v0, %v3226_v38 }
 0x228   : > { %2075 = vmatprep.subr.msk.bf16.mxu0 %vm3440_vm13, %v3511_v61  ;;  %v492_v48 = vsel %vm483_vm6, %v2580_v23, %v2530_v1 }
 0x229   : > { %v2664_v35 = vpop.permute.xlu1 %2663 }
 0x22a   : > { %v2666_v36 = vunpack.i.h.bf16 %v2664_v35  ;;  %v2665_v62 = vunpack.i.l.bf16 %v2664_v35 }
 0x22b   : > { %2078 = vmatpush1.bf16.msk.msra.mxu0 %vm3458_vm15, %v3525_v24 }
 0x22c   : > { %2081 = vmatprep.subr.msk.bf16.mxu0 %vm2902_vm3, %v3198_v34  ;;  %v981_v58 = vsel %vm968_vm8, %v2665_v62, %v2600_v5  ;;  %v983_v42 = vsel %vm968_vm8, %v2666_v36, %v2630_v46  ;;  %v786_v5 = vsel %vm774_vm9, %v2575_v51, %v2576_v63  ;;  %v784_v46 = vsel %vm774_vm9, %v2535_v30, %v2536_v45 }
 0x22d   : > { %v3539_v27 = vpop.permute.xlu1 %2668  ;;  %v1989_v28 = vpack.c.bf16 %v983_v42, %v981_v58  ;;  %v3562_v17 = vpack.c.bf16 %v786_v5, %v784_v46  ;;  %v4144_v62 = vpack.c.bf16 %v3183_v22, %v3120_v33  ;;  %v2611_v63 = vunpack.i.h.bf16 %v3337_v11  ;;  %v3590_v42 = vpop.permute.xlu0 %2723 }
 0x22e   : > { %v2610_v51 = vunpack.i.l.bf16 %v3337_v11  ;;  %v4145_v58 = vpack.c.bf16 %v3331_v53, %v3321_v18  ;;  %v493_v33 = vsel %vm483_vm6, %v2530_v1, %v2531_v41  ;;  %v2606_v22 = vunpack.i.h.bf16 %v3315_v3 }
 0x22f   : > { %1990 = vmatpush1.bf16.msra.mxu1 %v1989_v28  ;;  %2084 = vmatpush1.bf16.msk.msra.mxu0 %vm2906_vm4, %v3208_v50  ;;  %v3592_v45 = vpack.c.bf16 %v785_v8, %v783_v26  ;;  %v494_v18 = vsel %vm483_vm6, %v2581_v29, %v2570_v2  ;;  %v2003_v53 = vpack.c.bf16 %v495_v9, %v493_v33  ;;  %v2686_v2 = vunpack.i.h.bf16 %v3464_v55 }
 0x230   : > { %1993 = vmatprep.subr.msk.bf16.mxu1 %vm3440_vm13, %v4143_v60  ;;  %2087 = vmatprep.subr.msk.bf16.mxu0 %vm2902_vm3, %v3343_v7  ;;  %v788_v3 = vsel %vm774_vm9, %v2610_v51, %v2611_v63  ;;  %v2685_v5 = vunpack.i.l.bf16 %v3464_v55  ;;  %v497_v38 = vsel %vm483_vm6, %v2605_v6, %v2606_v22  ;;  %v2006_v0 = vpack.c.bf16 %v494_v18, %v492_v48 }
 0x231   : > { %v2674_v12 = vpop.permute.xlu1 %2673  ;;  %v3615_v23 = vpop.permute.xlu0 %2733  ;;  %v2656_v33 = vunpack.i.h.bf16 %v3506_v52  ;;  %v2655_v22 = vunpack.i.l.bf16 %v3506_v52  ;;  %v4147_v18 = vpack.c.bf16 %v3232_v14, %v3217_v4  ;;  %v2690_v4 = vunpack.i.l.bf16 %v3486_v49 }
 0x232   : > { %v2676_v35 = vunpack.i.h.bf16 %v2674_v12  ;;  %v2675_v36 = vunpack.i.l.bf16 %v2674_v12  ;;  %v496_v55 = vsel %vm483_vm6, %v2685_v5, %v2605_v6  ;;  %v2671_v6 = vunpack.i.h.bf16 %v3539_v27 }
 0x233   : > { %1996 = vmatpush1.bf16.msk.msra.mxu1 %vm3458_vm15, %v4144_v62  ;;  %2090 = vmatpush1.bf16.msk.msra.mxu0 %vm2906_vm4, %v3353_v20  ;;  %v2650_v62 = vunpack.i.l.bf16 %v3417_v40  ;;  %v2711_v5 = vunpack.i.h.bf16 %v3543_v39 }
 0x234   : > { %1999 = vmatprep.subr.msk.bf16.mxu1 %vm3440_vm13, %v4145_v58  ;;  %2093 = vmatprep.subr.msk.bf16.mxu0 %vm2902_vm3, %v3562_v17  ;;  %v499_v56 = vsel %vm483_vm6, %v2675_v36, %v2676_v35  ;;  %v498_v46 = vsel %vm483_vm6, %v2686_v2, %v2675_v36  ;;  %v2651_v36 = vunpack.i.h.bf16 %v3417_v40  ;;  %v2661_v40 = vunpack.i.h.bf16 %v3432_v16 }
 0x235   : > { %v2679_v11 = vpop.permute.xlu1 %2678  ;;  %v2009_v12 = vpack.c.bf16 %v499_v56, %v497_v38  ;;  %v2012_v29 = vpack.c.bf16 %v498_v46, %v496_v55  ;;  %v2706_v2 = vunpack.i.h.bf16 %v3523_v47  ;;  %v4149_v38 = vld [vmem:[#allocation7_spill] sm:$0xff] }
 0x236   : > { %v2681_v30 = vunpack.i.h.bf16 %v2679_v11  ;;  %v2680_v28 = vunpack.i.l.bf16 %v2679_v11  ;;  %v2660_v11 = vunpack.i.l.bf16 %v3432_v16  ;;  %v590_v52 = vsel %vm580_vm7, %v2650_v62, %v2651_v36 }
 0x237   : > { %2002 = vmatpush1.bf16.msk.msra.mxu1 %vm3458_vm15, %v4146_v31  ;;  %2096 = vmatpush1.bf16.msk.msra.mxu0 %vm2906_vm4, %v3592_v45  ;;  %v2691_v16 = vunpack.i.h.bf16 %v3486_v49  ;;  %v4151_v49 = vld [vmem:[#allocation10_spill] sm:$0xff] }
 0x238   : > { %v790_v60 = vsel %vm774_vm9, %v2680_v28, %v2681_v30  ;;  %2005 = vmatprep.subr.msk.bf16.mxu1 %vm3440_vm13, %v2003_v53  ;;  %v592_v30 = vsel %vm580_vm7, %v2655_v22, %v2656_v33  ;;  %v2726_v33 = vunpack.i.h.bf16 %v3590_v42 }
 0x239   : > { %v3612_v41 = vpack.c.bf16 %v790_v60, %v788_v3  ;;  %v2694_v1 = vpop.permute.xlu1 %2693  ;;  %v4148_v3 = vpack.c.bf16 %v3229_v15, %v3142_v44  ;;  %v2710_v60 = vunpack.i.l.bf16 %v3543_v39  ;;  %v1140_v44 = vsel %vm1130_vm10, %v2660_v11, %v2661_v40 }
 0x23a   : > { %v2696_v26 = vunpack.i.h.bf16 %v2694_v1  ;;  %v2695_v8 = vunpack.i.l.bf16 %v2694_v1  ;;  %v2705_v15 = vunpack.i.l.bf16 %v3523_v47  ;;  %v591_v1 = vsel %vm580_vm7, %v2691_v16, %v2655_v22  ;;  %v4153_v47 = vld [vmem:[#allocation8_spill] sm:$0xff] }
 0x23b   : > { %2008 = vmatpush1.bf16.msk.msra.mxu1 %vm3458_vm15, %v2006_v0  ;;  %2099 = vmatprep.subr.msk.bf16.mxu0 %vm2902_vm3, %v3612_v41  ;;  %v4150_v0 = vpack.c.bf16 %v3369_v21, %v4149_v38  ;;  %v2027_v46 = vpack.c.bf16 %v592_v30, %v590_v52  ;;  %v2725_v22 = vunpack.i.l.bf16 %v3590_v42 }
 0x23c   : > { %v787_v9 = vsel %vm774_vm9, %v2695_v8, %v2610_v51  ;;  %v789_v35 = vsel %vm774_vm9, %v2696_v26, %v2680_v28  ;;  %2011 = vmatprep.subr.msk.bf16.mxu1 %vm3440_vm13, %v2009_v12  ;;  %v2670_v51 = vunpack.i.l.bf16 %v3539_v27  ;;  %v3649_v27 = vpop.permute.xlu0 %2743 }
 0x23d   : > { %v3629_v63 = vpack.c.bf16 %v789_v35, %v787_v9  ;;  %v2699_v58 = vpop.permute.xlu1 %2698  ;;  %v589_v9 = vsel %vm580_vm7, %v2690_v4, %v2650_v62  ;;  %v1144_v62 = vsel %vm1130_vm10, %v2710_v60, %v2711_v5  ;;  %v2745_v16 = vunpack.i.l.bf16 %v3649_v27 }
 0x23e   : > { %v2701_v28 = vunpack.i.h.bf16 %v2699_v58  ;;  %v2700_v48 = vunpack.i.l.bf16 %v2699_v58  ;;  %v1142_v56 = vsel %vm1130_vm10, %v2670_v51, %v2671_v6  ;;  %v2030_v40 = vpack.c.bf16 %v591_v1, %v589_v9 }
 0x23f   : > { %2014 = vmatpush1.bf16.msk.msra.mxu1 %vm3458_vm15, %v2012_v29  ;;  %2102 = vmatpush1.bf16.msk.msra.mxu0 %vm2906_vm4, %v3629_v63  ;;  %v3673_v26 = vpack.c.bf16 %v1142_v56, %v1140_v44  ;;  %v4152_v29 = vld [vmem:[#allocation9_spill] sm:$0xff]  ;;  %v2735_v56 = vunpack.i.l.bf16 %v3615_v23  ;;  %v593_v4 = vsel %vm580_vm7, %v2725_v22, %v2705_v15  ;;  %v2746_v38 = vunpack.i.h.bf16 %v3649_v27  ;;  %v4156_v22 = vld [vmem:[#allocation3_spill] sm:$0xff] }
 0x240   : > { %2017 = vmatprep.subr.msk.bf16.mxu1 %vm2902_vm3, %v4147_v18  ;;  %2104 = vmatprep.subr.bf16.mxu0 %v3246_v32  ;;  %v1139_v55 = vsel %vm1130_vm10, %v2700_v48, %v2660_v11  ;;  %v1141_v21 = vsel %vm1130_vm10, %v2701_v28, %v2670_v51  ;;  %v3678_v35 = vpop.permute.xlu0 %2753  ;;  %v4154_v58 = vpack.c.bf16 %v4152_v29, %v4153_v47  ;;  %v2736_v48 = vunpack.i.h.bf16 %v3615_v23 }
 0x241   : > { %v2714_v53 = vpop.permute.xlu1 %2713  ;;  %v594_v51 = vsel %vm580_vm7, %v2705_v15, %v2706_v2  ;;  %v3695_v18 = vpack.c.bf16 %v1141_v21, %v1139_v55  ;;  %v872_v1 = vsel %vm871_vm0, %v2745_v16, %v2735_v56  ;;  %v2756_v27 = vunpack.i.h.bf16 %v3678_v35  ;;  %v4155_v55 = vld [vmem:[#allocation2_spill] sm:$0xff] }
 0x242   : > { %v2716_v14 = vunpack.i.h.bf16 %v2714_v53  ;;  %v2715_v31 = vunpack.i.l.bf16 %v2714_v53  ;;  %v873_v15 = vsel %vm871_vm0, %v2735_v56, %v2736_v48  ;;  %v1174_v56 = vld [vmem:[%s4094_s1 + $0x58] sm:$0xff] }
 0x243   : > { %2020 = vmatpush1.bf16.msk.msra.mxu1 %vm2906_vm4, %v4148_v3  ;;  %2106 = vmatpush1.bf16.msra.mxu0 %v3254_v54 }
 0x244   : > { %2023 = vmatprep.subr.msk.bf16.mxu1 %vm2902_vm3, %v4150_v0  ;;  %2108 = vmatprep.subr.bf16.mxu0 %v4151_v49  ;;  %v596_v36 = vsel %vm580_vm7, %v2715_v31, %v2716_v14  ;;  %v595_v53 = vsel %vm580_vm7, %v2726_v33, %v2715_v31  ;;  %v3712_v23 = vpop.permute.xlu0 %2763 }
 0x245   : > { %v2719_v12 = vpop.permute.xlu1 %2718  ;;  %v2033_v42 = vpack.c.bf16 %v596_v36, %v594_v51  ;;  %v2036_v3 = vpack.c.bf16 %v595_v53, %v593_v4  ;;  %v2766_v16 = vunpack.i.h.bf16 %v3712_v23  ;;  %v2765_v4 = vunpack.i.l.bf16 %v3712_v23 }
 0x246   : > { %v2721_v8 = vunpack.i.h.bf16 %v2719_v12  ;;  %v2720_v39 = vunpack.i.l.bf16 %v2719_v12  ;;  %v2755_v12 = vunpack.i.l.bf16 %v3678_v35  ;;  %v1169_v35 = vld [vmem:[%s4094_s1 + $0x30] sm:$0xff] }
 0x247   : > { %2026 = vmatpush1.bf16.msk.msra.mxu1 %vm2906_vm4, %v4154_v58  ;;  %2110 = vmatpush1.bf16.msra.mxu0 %v3508_v43  ;;  %v1171_v58 = vld [vmem:[%s4094_s1 + $0x40] sm:$0xff] }
 0x248   : > { %2029 = vmatprep.subr.msk.bf16.mxu1 %vm2902_vm3, %v2027_v46  ;;  %2112 = vmatprep.subr.bf16.mxu0 %v3673_v26  ;;  %v1146_v6 = vsel %vm1130_vm10, %v2720_v39, %v2721_v8  ;;  %v1163_v46 = vld [vmem:[%s4094_s1] sm:$0xff]  ;;  %v2774_v33 = vpop.permute.xlu0 %2773  ;;  %v879_v51 = vsel %vm871_vm0, %v2755_v12, %v2756_v27 }
 0x249   : > { %v2729_v11 = vpop.permute.xlu1 %2728  ;;  %v3697_v52 = vpack.c.bf16 %v1146_v6, %v1144_v62  ;;  %v1170_v62 = vld [vmem:[%s4094_s1 + $0x38] sm:$0xff]  ;;  %v1168_v6 = vld [vmem:[%s4094_s1 + $0x28] sm:$0xff] }
 0x24a   : > { %v2731_v30 = vunpack.i.h.bf16 %v2729_v11  ;;  %v2730_v28 = vunpack.i.l.bf16 %v2729_v11  ;;  %v4157_v11 = vld [vmem:[#allocation4_spill] sm:$0xff] }
 0x24b   : > { %2032 = vmatpush1.bf16.msk.msra.mxu1 %vm2906_vm4, %v2030_v40  ;;  %2114 = vmatpush1.bf16.msra.mxu0 %v3695_v18 }
 0x24c   : > { %2035 = vmatprep.subr.msk.bf16.mxu1 %vm2902_vm3, %v2033_v42  ;;  %2116 = vmatprep.subr.bf16.mxu0 %v3697_v52  ;;  %v1143_v14 = vsel %vm1130_vm10, %v2730_v28, %v2710_v60  ;;  %v1145_v31 = vsel %vm1130_vm10, %v2731_v30, %v2720_v39  ;;  %v1165_v60 = vld [vmem:[%s4094_s1 + $0x10] sm:$0xff]  ;;  %v1176_v30 = vld [vmem:[%s4094_s1 + $0x68] sm:$0xff]  ;;  %v2784_v23 = vpop.permute.xlu0 %2783 }
 0x24d   : > { %v2739_v2 = vpop.permute.xlu1 %2738  ;;  %v3714_v5 = vpack.c.bf16 %v1145_v31, %v1143_v14  ;;  %v2775_v14 = vunpack.i.l.bf16 %v2774_v33  ;;  %v4158_v31 = vld [vmem:[#allocation5_spill] sm:$0xff] }
 0x24e   : > { %v2741_v0 = vunpack.i.h.bf16 %v2739_v2  ;;  %v2740_v44 = vunpack.i.l.bf16 %v2739_v2  ;;  %v1173_v2 = vld [vmem:[%s4094_s1 + $0x50] sm:$0xff] }
 0x24f   : > { %2038 = vmatpush1.bf16.msk.msra.mxu1 %vm2906_vm4, %v2036_v3  ;;  %2118 = vmatpush1.bf16.msra.mxu0 %v3714_v5  ;;  %v1175_v3 = vld [vmem:[%s4094_s1 + $0x60] sm:$0xff] }
 0x250   : > { %v874_v8 = vsel %vm871_vm0, %v2746_v38, %v2740_v44  ;;  %v875_v39 = vsel %vm871_vm0, %v2740_v44, %v2741_v0  ;;  %2143 = vmatprep.subr.bf16.mxu1 %v4155_v55  ;;  %v4159_v44 = vld [vmem:[#allocation11_spill] sm:$0xff]  ;;  %v880_v55 = vsel %vm871_vm0, %v2775_v14, %v2765_v4 }
 0x251   : > { %v2119_v21 = vpack.c.bf16 %v875_v39, %v873_v15  ;;  %v2122_v9 = vpack.c.bf16 %v874_v8, %v872_v1  ;;  %v2749_v36 = vpop.permute.xlu1 %2748  ;;  %v881_v39 = vsel %vm871_vm0, %v2765_v4, %v2766_v16  ;;  %v4163_v16 = vld [vmem:[#allocation15_spill] sm:$0xff] }
 0x252   : > { %v2751_v29 = vunpack.i.h.bf16 %v2749_v36  ;;  %v2750_v47 = vunpack.i.l.bf16 %v2749_v36  ;;  %1569 = vmatmul.mubr.f32.vlgmr.msra.gmra.mrb[0].mxu0 %v1165_v60  ;;  %1438 = vmatmul.mubr.f32.vlgmr.msra.gmra.mrb[0].mxu1 %v1163_v46  ;;  %v1181_v60 = vld [vmem:[%s4094_s1 + $0x90] sm:$0xff]  ;;  %v2776_v46 = vunpack.i.h.bf16 %v2774_v33  ;;  %v1178_v36 = vld [vmem:[%s4094_s1 + $0x78] sm:$0xff] }
 0x253   : > { %2159 = vmatpush1.bf16.msra.mxu1 %v4156_v22  ;;  %2121 = vmatprep.subr.msk.bf16.mxu0 %vm3440_vm13, %v2119_v21  ;;  %v4160_v21 = vld [vmem:[#allocation12_spill] sm:$0xff]  ;;  %v4161_v33 = vld [vmem:[#allocation13_spill] sm:$0xff] }
 0x254   : > { %v877_v40 = vsel %vm871_vm0, %v2750_v47, %v2751_v29  ;;  %2144 = vmatprep.subr.bf16.mxu1 %v4157_v11  ;;  %2124 = vmatpush1.bf16.msk.msra.mxu0 %vm3458_vm15, %v2122_v9  ;;  %v1180_v9 = vld [vmem:[%s4094_s1 + $0x88] sm:$0xff]  ;;  %v2786_v29 = vunpack.i.h.bf16 %v2784_v23  ;;  %v1186_v11 = vld [vmem:[%s4094_s1 + $0xb8] sm:$0xff] }
 0x255   : > { %v2125_v53 = vpack.c.bf16 %v879_v51, %v877_v40  ;;  %v2759_v42 = vpop.permute.xlu1 %2758  ;;  %1574 = vmatprep.mubr.f32.mxu0 %v1171_v58  ;;  %1443 = vmatprep.mubr.f32.mxu1 %v1169_v35 }
 0x256   : > { %v2761_v28 = vunpack.i.h.bf16 %v2759_v42  ;;  %v2760_v48 = vunpack.i.l.bf16 %v2759_v42  ;;  %1575 = vmatmul.mubr.f32.gmra.mrb[2].mxu0 %v1170_v62  ;;  %1444 = vmatmul.mubr.f32.gmra.mrb[2].mxu1 %v1168_v6  ;;  %v4162_v42 = vld [vmem:[#allocation14_spill] sm:$0xff] }
 0x257   : > { %2160 = vmatpush1.bf16.msra.mxu1 %v4158_v31  ;;  %2127 = vmatprep.subr.msk.bf16.mxu0 %vm3440_vm13, %v2125_v53  ;;  %v1184_v53 = vld [vmem:[%s4094_s1 + $0xa8] sm:$0xff]  ;;  %v1191_v31 = vld [vmem:[%s4094_s1 + $0xe0] sm:$0xff] }
 0x258   : > { %v878_v38 = vsel %vm871_vm0, %v2761_v28, %v2755_v12  ;;  %v876_v0 = vsel %vm871_vm0, %v2760_v48, %v2750_v47  ;;  %2145 = vmatprep.subr.bf16.mxu1 %v4159_v44  ;;  %1578 = vmatprep.mubr.f32.mxu0 %v1176_v30  ;;  %v1179_v12 = vld [vmem:[%s4094_s1 + $0x80] sm:$0xff]  ;;  %v2785_v47 = vunpack.i.l.bf16 %v2784_v23  ;;  %v1185_v30 = vld [vmem:[%s4094_s1 + $0xb0] sm:$0xff]  ;;  %v1190_v44 = vld [vmem:[%s4094_s1 + $0xd8] sm:$0xff] }
 0x259   : > { %v2128_v15 = vpack.c.bf16 %v878_v38, %v876_v0  ;;  %v2769_v1 = vpop.permute.xlu1 %2768  ;;  %1447 = vmatprep.mubr.f32.mxu1 %v1174_v56  ;;  %v1183_v28 = vld [vmem:[%s4094_s1 + $0xa0] sm:$0xff]  ;;  %v1189_v38 = vld [vmem:[%s4094_s1 + $0xd0] sm:$0xff]  ;;  %v1188_v23 = vld [vmem:[%s4094_s1 + $0xc8] sm:$0xff] }
 0x25a   : > { %v2771_v27 = vunpack.i.h.bf16 %v2769_v1  ;;  %v2770_v8 = vunpack.i.l.bf16 %v2769_v1  ;;  %1579 = vmatmul.mubr.f32.gmra.mrb[4].mxu0 %v1175_v3  ;;  %1448 = vmatmul.mubr.f32.gmra.mrb[4].mxu1 %v1173_v2  ;;  %v887_v48 = vsel %vm871_vm0, %v2785_v47, %v2786_v29  ;;  %v4164_v0 = vld [vmem:[#allocation16_spill] sm:$0xff]  ;;  %v1219_v29 = vld [vmem:[%s4094_s1 + $0x1c0] sm:$0xff] }
 0x25b   : > { %2161 = vmatpush1.bf16.msra.mxu1 %v4160_v21  ;;  %2130 = vmatpush1.bf16.msk.msra.mxu0 %vm3458_vm15, %v2128_v15  ;;  %v1198_v21 = vld [vmem:[%s4094_s1 + $0x118] sm:$0xff] }
 0x25c   : > { %v882_v58 = vsel %vm871_vm0, %v2776_v46, %v2770_v8  ;;  %v883_v35 = vsel %vm871_vm0, %v2770_v8, %v2771_v27  ;;  %2146 = vmatprep.subr.bf16.mxu1 %v4161_v33  ;;  %1582 = vmatprep.mubr.f32.mxu0 %v1181_v60  ;;  %v4165_v60 = vld [vmem:[#allocation6_spill] sm:$0xff]  ;;  %v1196_v27 = vld [vmem:[%s4094_s1 + $0x108] sm:$0xff]  ;;  %v1194_v8 = vld [vmem:[%s4094_s1 + $0xf8] sm:$0xff] }
 0x25d   : > { %v2131_v22 = vpack.c.bf16 %v883_v35, %v881_v39  ;;  %v2134_v62 = vpack.c.bf16 %v882_v58, %v880_v55  ;;  %v2779_v6 = vpop.permute.xlu1 %2778  ;;  %1451 = vmatprep.mubr.f32.mxu1 %v1179_v12  ;;  %v1195_v12 = vld [vmem:[%s4094_s1 + $0x100] sm:$0xff]  ;;  %v1193_v39 = vld [vmem:[%s4094_s1 + $0xf0] sm:$0xff]  ;;  %v1206_v35 = vld [vmem:[%s4094_s1 + $0x158] sm:$0xff] }
 0x25e   : > { %v2781_v51 = vunpack.i.h.bf16 %v2779_v6  ;;  %v2780_v40 = vunpack.i.l.bf16 %v2779_v6  ;;  %1583 = vmatmul.mubr.f32.gmra.mrb[6].mxu0 %v1180_v9  ;;  %1452 = vmatmul.mubr.f32.gmra.mrb[6].mxu1 %v1178_v36  ;;  %v1199_v55 = vld [vmem:[%s4094_s1 + $0x120] sm:$0xff]  ;;  %v1204_v9 = vld [vmem:[%s4094_s1 + $0x148] sm:$0xff] }
 0x25f   : > { %2162 = vmatpush1.bf16.msra.mxu1 %v4162_v42  ;;  %2133 = vmatprep.subr.msk.bf16.mxu0 %vm3440_vm13, %v2131_v22  ;;  %v1167_v36 = vld [vmem:[%s4094_s1 + $0x20] sm:$0xff]  ;;  %v1212_v22 = vld [vmem:[%s4094_s1 + $0x188] sm:$0xff]  ;;  %v1226_v42 = vld [vmem:[%s4094_s1 + $0x1f8] sm:$0xff] }
 0x260   : > { %v885_v56 = vsel %vm871_vm0, %v2780_v40, %v2781_v51  ;;  %2147 = vmatprep.subr.msk.bf16.mxu1 %vm3440_vm13, %v4163_v16  ;;  %2136 = vmatpush1.bf16.msk.msra.mxu0 %vm3458_vm15, %v2134_v62  ;;  %v1239_v58 = vld [vmem:[%s4094_s1 + $0x260] sm:$0xff]  ;;  %v1216_v62 = vld [vmem:[%s4094_s1 + $0x1a8] sm:$0xff]  ;;  %v1217_v51 = vld [vmem:[%s4094_s1 + $0x1b0] sm:$0xff] }
 0x261   : > { %v2137_v4 = vpack.c.bf16 %v887_v48, %v885_v56  ;;  %v2789_v14 = vpop.permute.xlu1 %2788  ;;  %1586 = vmatprep.mubr.f32.mxu0 %v1186_v11  ;;  %1455 = vmatprep.mubr.f32.mxu1 %v1184_v53  ;;  %v1211_v33 = vld [vmem:[%s4094_s1 + $0x180] sm:$0xff]  ;;  %v1220_v11 = vld [vmem:[%s4094_s1 + $0x1c8] sm:$0xff]  ;;  %v1222_v53 = vld [vmem:[%s4094_s1 + $0x1d8] sm:$0xff] }
 0x262   : > { %v2791_v3 = vunpack.i.h.bf16 %v2789_v14  ;;  %v2790_v2 = vunpack.i.l.bf16 %v2789_v14  ;;  %1587 = vmatmul.mubr.f32.gmra.mrb[8].mxu0 %v1185_v30  ;;  %1456 = vmatmul.mubr.f32.gmra.mrb[8].mxu1 %v1183_v28  ;;  %v1215_v6 = vld [vmem:[%s4094_s1 + $0x1a0] sm:$0xff]  ;;  %v1225_v30 = vld [vmem:[%s4094_s1 + $0x1f0] sm:$0xff]  ;;  %v1230_v56 = vld [vmem:[%s4094_s1 + $0x218] sm:$0xff] }
 0x263   : > { %2163 = vmatpush1.bf16.msk.msra.mxu1 %vm3458_vm15, %v4164_v0  ;;  %2139 = vmatprep.subr.msk.bf16.mxu0 %vm3440_vm13, %v2137_v4  ;;  %v1227_v28 = vld [vmem:[%s4094_s1 + $0x200] sm:$0xff]  ;;  %v1232_v16 = vld [vmem:[%s4094_s1 + $0x228] sm:$0xff] }
 0x264   : > { %v886_v15 = vsel %vm871_vm0, %v2791_v3, %v2785_v47  ;;  %v884_v1 = vsel %vm871_vm0, %v2790_v2, %v2780_v40  ;;  %2148 = vmatprep.subr.msk.bf16.mxu1 %vm3440_vm13, %v4165_v60  ;;  %1590 = vmatprep.mubr.f32.mxu0 %v1191_v31  ;;  %v1224_v47 = vld [vmem:[%s4094_s1 + $0x1e8] sm:$0xff]  ;;  %v1221_v40 = vld [vmem:[%s4094_s1 + $0x1d0] sm:$0xff]  ;;  %v1231_v48 = vld [vmem:[%s4094_s1 + $0x220] sm:$0xff] }
 0x265   : > { %v2140_v46 = vpack.c.bf16 %v886_v15, %v884_v1  ;;  %1459 = vmatprep.mubr.f32.mxu1 %v1189_v38  ;;  %v1236_v4 = vld [vmem:[%s4094_s1 + $0x248] sm:$0xff]  ;;  %v1235_v14 = vld [vmem:[%s4094_s1 + $0x240] sm:$0xff]  ;;  %v1237_v31 = vld [vmem:[%s4094_s1 + $0x250] sm:$0xff] }
 0x266   : > { %1591 = vmatmul.mubr.f32.gmra.mrb[10].mxu0 %v1190_v44  ;;  %1460 = vmatmul.mubr.f32.gmra.mrb[10].mxu1 %v1188_v23  ;;  %v1241_v3 = vld [vmem:[%s4094_s1 + $0x270] sm:$0xff]  ;;  %v1240_v2 = vld [vmem:[%s4094_s1 + $0x268] sm:$0xff]  ;;  %v1242_v38 = vld [vmem:[%s4094_s1 + $0x278] sm:$0xff] }
 0x267   : > { %2164 = vmatpush1.bf16.msk.msra.mxu1 %vm3458_vm15, %v3294_v37  ;;  %2142 = vmatpush1.bf16.msk.msra.mxu0 %vm3458_vm15, %v2140_v46  ;;  %v1201_v37 = vld [vmem:[%s4094_s1 + $0x130] sm:$0xff] }
 0x268   : > { %2149 = vmatprep.subr.msk.bf16.mxu1 %vm3440_vm13, %v3483_v59  ;;  %1594 = vmatprep.mubr.f32.mxu0 %v1196_v27  ;;  %v1200_v59 = vld [vmem:[%s4094_s1 + $0x128] sm:$0xff] }
 0x269   : > { %1463 = vmatprep.mubr.f32.mxu1 %v1194_v8 }
 0x26a   : > { %1595 = vmatmul.mubr.f32.gmra.mrb[12].mxu0 %v1195_v12  ;;  %1464 = vmatmul.mubr.f32.gmra.mrb[12].mxu1 %v1193_v39 }
 0x26b   : > { %2165 = vmatpush1.bf16.msk.msra.mxu1 %vm3458_vm15, %v3504_v25  ;;  %1598 = vmatprep.mubr.f32.mxu0 %v1201_v37  ;;  %v2811_v25 = vmov 0.0  }
 0x26c   : > { %2150 = vmatprep.subr.msk.bf16.mxu1 %vm3440_vm13, %v3511_v61  ;;  %1467 = vmatprep.mubr.f32.mxu1 %v1199_v55  ;;  %v1208_v61 = vld [vmem:[%s4094_s1 + $0x168] sm:$0xff] }
 0x26e   : > { %1599 = vmatmul.mubr.f32.gmra.mrb[14].mxu0 %v1200_v59  ;;  %1468 = vmatmul.mubr.f32.gmra.mrb[14].mxu1 %v1198_v21 }
 0x26f   : > { %2166 = vmatpush1.bf16.msk.msra.mxu1 %vm3458_vm15, %v3525_v24  ;;  %1699 = vmatprep.mubr.f32.mxu0 %v2811_v25  ;;  %v1214_v24 = vld [vmem:[%s4094_s1 + $0x198] sm:$0xff] }
 0x270   : > { %2151 = vmatprep.subr.msk.bf16.mxu1 %vm2902_vm3, %v3198_v34  ;;  %1471 = vmatprep.mubr.f32.mxu1 %v1204_v9  ;;  %v1172_v34 = vld [vmem:[%s4094_s1 + $0x48] sm:$0xff] }
 0x272   : > { %1931 = vmatmul.mubr.msk.f32.vlgmr.msra.gmra.mrb[0].mxu0 %vm1324_vm1, %v1167_v36  ;;  %1472 = vmatmul.mubr.f32.gmra.mrb[16].mxu1 %v1203_v19 }
 0x273   : > { %2167 = vmatpush1.bf16.msk.msra.mxu1 %vm2906_vm4, %v3208_v50  ;;  %1475 = vmatprep.mubr.f32.mxu1 %v1209_v57  ;;  %v1213_v50 = vld [vmem:[%s4094_s1 + $0x190] sm:$0xff] }
 0x274   : > { %2152 = vmatprep.subr.msk.bf16.mxu1 %vm2902_vm3, %v3343_v7  ;;  %1705 = vmatprep.mubr.f32.mxu0 %v2811_v25  ;;  %v1177_v7 = vld [vmem:[%s4094_s1 + $0x70] sm:$0xff] }
 0x276   : > { %1476 = vmatmul.mubr.f32.gmra.mrb[18].mxu1 %v1208_v61  ;;  %1932 = vmatmul.mubr.msk.f32.gmra.mrb[16].mxu0 %vm1324_vm1, %v1172_v34 }
 0x277   : > { %2168 = vmatpush1.bf16.msk.msra.mxu1 %vm2906_vm4, %v3353_v20  ;;  %1479 = vmatprep.mubr.f32.mxu1 %v1214_v24  ;;  %v1218_v20 = vld [vmem:[%s4094_s1 + $0x1b8] sm:$0xff] }
 0x278   : > { %2153 = vmatprep.subr.msk.bf16.mxu1 %vm2902_vm3, %v3562_v17  ;;  %1709 = vmatprep.mubr.f32.mxu0 %v2811_v25  ;;  %v1182_v17 = vld [vmem:[%s4094_s1 + $0x98] sm:$0xff] }
 0x27a   : > { %1480 = vmatmul.mubr.f32.gmra.mrb[20].mxu1 %v1213_v50  ;;  %1933 = vmatmul.mubr.msk.f32.gmra.mrb[18].mxu0 %vm1324_vm1, %v1177_v7 }
 0x27b   : > { %2169 = vmatpush1.bf16.msk.msra.mxu1 %vm2906_vm4, %v3592_v45  ;;  %1483 = vmatprep.mubr.f32.mxu1 %v1219_v29  ;;  %v1223_v45 = vld [vmem:[%s4094_s1 + $0x1e0] sm:$0xff] }
 0x27c   : > { %2154 = vmatprep.subr.msk.bf16.mxu1 %vm2902_vm3, %v3612_v41  ;;  %1713 = vmatprep.mubr.f32.mxu0 %v2811_v25  ;;  %v1229_v41 = vld [vmem:[%s4094_s1 + $0x210] sm:$0xff] }
 0x27e   : > { %1484 = vmatmul.mubr.f32.gmra.mrb[22].mxu1 %v1218_v20  ;;  %1934 = vmatmul.mubr.msk.f32.gmra.mrb[20].mxu0 %vm1324_vm1, %v1182_v17 }
 0x27f   : > { %2170 = vmatpush1.bf16.msk.msra.mxu1 %vm2906_vm4, %v3629_v63  ;;  %1487 = vmatprep.mubr.f32.mxu1 %v1224_v47  ;;  %v1234_v63 = vld [vmem:[%s4094_s1 + $0x238] sm:$0xff] }
 0x280   : > { %2155 = vmatprep.subr.bf16.mxu1 %v3246_v32  ;;  %1717 = vmatprep.mubr.f32.mxu0 %v2811_v25  ;;  %v1192_v32 = vld [vmem:[%s4094_s1 + $0xe8] sm:$0xff] }
 0x282   : > { %1488 = vmatmul.mubr.f32.gmra.mrb[24].mxu1 %v1223_v45  ;;  %1935 = vmatmul.mubr.msk.f32.gmra.mrb[22].mxu0 %vm1324_vm1, %v1187_v10 }
 0x283   : > { %2171 = vmatpush1.bf16.msra.mxu1 %v3254_v54  ;;  %1491 = vmatprep.mubr.f32.mxu1 %v1229_v41  ;;  %v1233_v54 = vld [vmem:[%s4094_s1 + $0x230] sm:$0xff] }
 0x284   : > { %2156 = vmatprep.subr.bf16.mxu1 %v4151_v49  ;;  %1721 = vmatprep.mubr.f32.mxu0 %v2811_v25  ;;  %v1197_v49 = vld [vmem:[%s4094_s1 + $0x110] sm:$0xff] }
 0x286   : > { %1492 = vmatmul.mubr.f32.gmra.mrb[26].mxu1 %v1228_v13  ;;  %1936 = vmatmul.mubr.msk.f32.gmra.mrb[24].mxu0 %vm1324_vm1, %v1192_v32 }
 0x287   : > { %2172 = vmatpush1.bf16.msra.mxu1 %v3508_v43  ;;  %1495 = vmatprep.mubr.f32.mxu1 %v1234_v63  ;;  %v1238_v43 = vld [vmem:[%s4094_s1 + $0x258] sm:$0xff] }
 0x288   : > { %2157 = vmatprep.subr.bf16.mxu1 %v3673_v26  ;;  %1725 = vmatprep.mubr.f32.mxu0 %v2811_v25  ;;  %v1202_v26 = vld [vmem:[%s4094_s1 + $0x138] sm:$0xff] }
 0x28a   : > { %1496 = vmatmul.mubr.f32.gmra.mrb[28].mxu1 %v1233_v54  ;;  %1937 = vmatmul.mubr.msk.f32.gmra.mrb[26].mxu0 %vm1324_vm1, %v1197_v49 }
 0x28b   : > { %2173 = vmatpush1.bf16.msra.mxu1 %v3695_v18  ;;  %1499 = vmatprep.mubr.f32.mxu1 %v1239_v58  ;;  %v1205_v18 = vld [vmem:[%s4094_s1 + $0x150] sm:$0xff] }
 0x28c   : > { %2158 = vmatprep.subr.bf16.mxu1 %v3697_v52  ;;  %1729 = vmatprep.mubr.f32.mxu0 %v2811_v25  ;;  %v1207_v52 = vld [vmem:[%s4094_s1 + $0x160] sm:$0xff] }
 0x28e   : > { %1500 = vmatmul.mubr.f32.gmra.mrb[30].mxu1 %v1238_v43  ;;  %1938 = vmatmul.mubr.msk.f32.gmra.mrb[28].mxu0 %vm1324_vm1, %v1202_v26 }
 0x28f   : > { %2174 = vmatpush1.bf16.msra.mxu1 %v3714_v5  ;;  %1602 = vmatprep.mubr.f32.mxu1 %v1206_v35  ;;  %v1210_v5 = vld [vmem:[%s4094_s1 + $0x178] sm:$0xff] }
 0x290   : > { %1733 = vmatprep.mubr.f32.mxu0 %v2811_v25 }
 0x292   : > { %1603 = vmatmul.mubr.f32.vlgmr.msra.gmra.mrb[32].mxu1 %v1205_v18  ;;  %1939 = vmatmul.mubr.msk.f32.gmra.mrb[30].mxu0 %vm1324_vm1, %v1207_v52 }
 0x293   : > { %1606 = vmatprep.mubr.f32.mxu1 %v1211_v33  ;;  %1737 = vmatprep.mubr.f32.mxu0 %v2811_v25 }
 0x296   : > { %1607 = vmatmul.mubr.f32.gmra.mrb[34].mxu1 %v1210_v5  ;;  %1940 = vmatmul.mubr.msk.f32.gmra.mrb[32].mxu0 %vm1324_vm1, %v1212_v22 }
 0x297   : > { %1610 = vmatprep.mubr.f32.mxu1 %v1216_v62  ;;  %1741 = vmatprep.mubr.f32.mxu0 %v2811_v25 }
 0x29a   : > { %1611 = vmatmul.mubr.f32.gmra.mrb[36].mxu1 %v1215_v6  ;;  %1941 = vmatmul.mubr.msk.f32.gmra.mrb[34].mxu0 %vm1324_vm1, %v1217_v51 }
 0x29b   : > { %1614 = vmatprep.mubr.f32.mxu1 %v1221_v40  ;;  %1745 = vmatprep.mubr.f32.mxu0 %v2811_v25 }
 0x29e   : > { %1615 = vmatmul.mubr.f32.gmra.mrb[38].mxu1 %v1220_v11  ;;  %1942 = vmatmul.mubr.msk.f32.gmra.mrb[36].mxu0 %vm1324_vm1, %v1222_v53 }
 0x29f   : > { %1618 = vmatprep.mubr.f32.mxu1 %v1226_v42  ;;  %1749 = vmatprep.mubr.f32.mxu0 %v2811_v25 }
 0x2a1   : > { %v1262_v20 = vpop.permute.xlu0 %1261 }
 0x2a2   : > { %1619 = vmatmul.mubr.f32.gmra.mrb[40].mxu1 %v1225_v30  ;;  %1943 = vmatmul.mubr.msk.f32.gmra.mrb[38].mxu0 %vm1324_vm1, %v1227_v28 }
 0x2a3   : > { %1622 = vmatprep.mubr.f32.mxu1 %v1231_v48  ;;  %1753 = vmatprep.mubr.f32.mxu0 %v2811_v25 }
 0x2a6   : > { %1623 = vmatmul.mubr.f32.gmra.mrb[42].mxu1 %v1230_v56  ;;  %1944 = vmatmul.mubr.msk.f32.gmra.mrb[40].mxu0 %vm1324_vm1, %v1232_v16 }
 0x2a7   : > { %1626 = vmatprep.mubr.f32.mxu1 %v1236_v4  ;;  %1757 = vmatprep.mubr.f32.mxu0 %v2811_v25 }
 0x2aa   : > { %1627 = vmatmul.mubr.f32.gmra.mrb[44].mxu1 %v1235_v14  ;;  %1945 = vmatmul.mubr.msk.f32.gmra.mrb[42].mxu0 %vm1324_vm1, %v1237_v31 }
 0x2ab   : > { %1630 = vmatprep.mubr.f32.mxu1 %v1241_v3  ;;  %1761 = vmatprep.mubr.f32.mxu0 %v2811_v25 }
 0x2ae   : > { %1631 = vmatmul.mubr.f32.gmra.mrb[46].mxu1 %v1240_v2  ;;  %1946 = vmatmul.mubr.msk.f32.gmra.mrb[44].mxu0 %vm1324_vm1, %v1242_v38 }
 0x325   : > { %v1439_v0 = vpop.f32.mrb[0].mxu1 }
 0x326   : > { %v1441_v44 = vpop.f32.mrb[1].mxu1  ;;  %v1440_v41 = vadd.f32 %v1439_v0, %v1262_v20 }
 0x327   : > { %v1442_v13 = vadd.f32 %v1441_v44, %v1262_v20 }
 0x329   : > { %v1445_v23 = vpop.f32.mrb[2].mxu1  ;;  %v1576_v15 = vpop.f32.mrb[2].mxu0 }
 0x32a   : > { %v1446_v1 = vpop.f32.mrb[3].mxu1  ;;  %v1577_v60 = vpop.f32.mrb[3].mxu0 }
 0x32d   : > { %v1449_v46 = vpop.f32.mrb[4].mxu1  ;;  %v1580_v27 = vpop.f32.mrb[4].mxu0 }
 0x32e   : > { %v1450_v8 = vpop.f32.mrb[5].mxu1  ;;  %v1581_v12 = vpop.f32.mrb[5].mxu0 }
 0x331   : > { %v1453_v39 = vpop.f32.mrb[6].mxu1  ;;  %v1584_v37 = vpop.f32.mrb[6].mxu0 }
 0x332   : > { %v1454_v55 = vpop.f32.mrb[7].mxu1  ;;  %v1585_v59 = vpop.f32.mrb[7].mxu0 }
 0x335   : > { %v1457_v21 = vpop.f32.mrb[8].mxu1  ;;  %v1588_v9 = vpop.f32.mrb[8].mxu0 }
 0x336   : > { %v1458_v25 = vpop.f32.mrb[9].mxu1  ;;  %v1589_v36 = vpop.f32.mrb[9].mxu0 }
 0x339   : > { %v1461_v19 = vpop.f32.mrb[10].mxu1  ;;  %v1592_v57 = vpop.f32.mrb[10].mxu0 }
 0x33a   : > { %v1462_v61 = vpop.f32.mrb[11].mxu1  ;;  %v1593_v34 = vpop.f32.mrb[11].mxu0 }
 0x33d   : > { %v1465_v24 = vpop.f32.mrb[12].mxu1  ;;  %v1596_v50 = vpop.f32.mrb[12].mxu0 }
 0x33e   : > { %v1466_v7 = vpop.f32.mrb[13].mxu1  ;;  %v1597_v29 = vpop.f32.mrb[13].mxu0 }
 0x341   : > { %v1469_v17 = vpop.f32.mrb[14].mxu1  ;;  %v1600_v47 = vpop.f32.mrb[14].mxu0 }
 0x342   : > { %v1470_v45 = vpop.f32.mrb[15].mxu1  ;;  %v1601_v10 = vpop.f32.mrb[15].mxu0 }
 0x345   : > { %v1701_v32 = vpop.f32.mrb[0].mxu0  ;;  %v1473_v63 = vpop.f32.mrb[16].mxu1 }
 0x346   : > { %v2176_v54 = vadd.f32 %v1701_v32, %v1440_v41  ;;  %v1703_v49 = vpop.f32.mrb[1].mxu0  ;;  %v1474_v58 = vpop.f32.mrb[17].mxu1 }
 0x347   : > { %v2178_v43 = vadd.f32 %v1703_v49, %v1442_v13 }
 0x349   : > { %v1768_v26 = vcombine.low %v2176_v54, %v2178_v43  ;;  %v1477_v35 = vpop.f32.mrb[18].mxu1  ;;  %v1707_v18 = vpop.f32.mrb[16].mxu0 }
 0x34a   : > { %v1478_v52 = vpop.f32.mrb[19].mxu1  ;;  %v1708_v33 = vpop.f32.mrb[17].mxu0 }
 0x34b   : > { %1770 = vst [vmem:[%s170_s17] sm:$0x77] %v1768_v26 }
 0x34d   : > { %v1481_v5 = vpop.f32.mrb[20].mxu1  ;;  %v1711_v22 = vpop.f32.mrb[18].mxu0 }
 0x34e   : > { %v1482_v62 = vpop.f32.mrb[21].mxu1  ;;  %v1712_v6 = vpop.f32.mrb[19].mxu0 }
 0x351   : > { %v1485_v51 = vpop.f32.mrb[22].mxu1  ;;  %v1715_v40 = vpop.f32.mrb[20].mxu0 }
 0x352   : > { %v1486_v11 = vpop.f32.mrb[23].mxu1  ;;  %v1716_v53 = vpop.f32.mrb[21].mxu0 }
 0x355   : > { %v1489_v42 = vpop.f32.mrb[24].mxu1  ;;  %v1719_v30 = vpop.f32.mrb[22].mxu0 }
 0x356   : > { %v1490_v28 = vpop.f32.mrb[25].mxu1  ;;  %v1720_v48 = vpop.f32.mrb[23].mxu0 }
 0x359   : > { %v1493_v56 = vpop.f32.mrb[26].mxu1  ;;  %v1723_v16 = vpop.f32.mrb[24].mxu0 }
 0x35a   : > { %v1494_v4 = vpop.f32.mrb[27].mxu1  ;;  %v1724_v14 = vpop.f32.mrb[25].mxu0 }
 0x35d   : > { %v1497_v31 = vpop.f32.mrb[28].mxu1  ;;  %v1727_v3 = vpop.f32.mrb[26].mxu0 }
 0x35e   : > { %v1498_v2 = vpop.f32.mrb[29].mxu1  ;;  %v1728_v38 = vpop.f32.mrb[27].mxu0 }
 0x361   : > { %v1501_v0 = vpop.f32.mrb[30].mxu1  ;;  %v1731_v44 = vpop.f32.mrb[28].mxu0 }
 0x362   : > { %v1502_v23 = vpop.f32.mrb[31].mxu1  ;;  %v1732_v15 = vpop.f32.mrb[29].mxu0 }
 0x365   : > { %v1604_v1 = vpop.f32.mrb[32].mxu1  ;;  %v1735_v60 = vpop.f32.mrb[30].mxu0 }
 0x366   : > { %v1605_v46 = vpop.f32.mrb[33].mxu1  ;;  %v1736_v27 = vpop.f32.mrb[31].mxu0 }
 0x369   : > { %v1608_v8 = vpop.f32.mrb[34].mxu1  ;;  %v1739_v12 = vpop.f32.mrb[32].mxu0 }
 0x36a   : > { %v1609_v39 = vpop.f32.mrb[35].mxu1  ;;  %v1740_v37 = vpop.f32.mrb[33].mxu0 }
 0x36d   : > { %v1612_v55 = vpop.f32.mrb[36].mxu1  ;;  %v1743_v59 = vpop.f32.mrb[34].mxu0 }
 0x36e   : > { %v1613_v21 = vpop.f32.mrb[37].mxu1  ;;  %v1744_v9 = vpop.f32.mrb[35].mxu0 }
 0x371   : > { %v1616_v25 = vpop.f32.mrb[38].mxu1  ;;  %v1747_v36 = vpop.f32.mrb[36].mxu0 }
 0x372   : > { %v1617_v19 = vpop.f32.mrb[39].mxu1  ;;  %v1748_v57 = vpop.f32.mrb[37].mxu0 }
 0x375   : > { %v1620_v61 = vpop.f32.mrb[40].mxu1  ;;  %v1751_v34 = vpop.f32.mrb[38].mxu0 }
 0x376   : > { %v1621_v24 = vpop.f32.mrb[41].mxu1  ;;  %v1752_v50 = vpop.f32.mrb[39].mxu0 }
 0x379   : > { %v1624_v7 = vpop.f32.mrb[42].mxu1  ;;  %v1755_v29 = vpop.f32.mrb[40].mxu0 }
 0x37a   : > { %v1625_v20 = vpop.f32.mrb[43].mxu1  ;;  %v1756_v17 = vpop.f32.mrb[41].mxu0 }
 0x37d   : > { %v1628_v47 = vpop.f32.mrb[44].mxu1  ;;  %v1759_v45 = vpop.f32.mrb[42].mxu0 }
 0x37e   : > { %v1629_v10 = vpop.f32.mrb[45].mxu1  ;;  %v1760_v41 = vpop.f32.mrb[43].mxu0 }
 0x381   : > { %v1632_v13 = vpop.f32.mrb[46].mxu1  ;;  %v1763_v32 = vpop.f32.mrb[44].mxu0 }
 0x382   : > { %v1633_v63 = vpop.f32.mrb[47].mxu1  ;;  %v1764_v54 = vpop.f32.mrb[45].mxu0 }
 0x383 PF: > { %s13_s12 = sadd.s32 1, %s2799_s12  }
 0x384   : > { %p10_p4 = scmp.ge.s32.totalorder %s13_s12, 4  }
 0x386   :  { %12 = sbr.rel (!%p10_p4) target bundleno = 1 (0x1), region = 62 }

</bundles_post_ra>
